<compile_context>
chip_gen: v5e
topology: v5e:2x2
jax: 0.10.0
libtpu: 0.0.40
codegen_flags: <defaults>
</compile_context>

<pallas_src>
import numpy as np
import jax
import jax.numpy as jnp
from jax.experimental import pallas as pl
from jax.experimental.pallas import tpu as pltpu


# ----------------------------------------------------------------------------
# Host glue: bev shape + point->pillar grouping (plain numpy)
# ----------------------------------------------------------------------------
def bev_spatial_shape(point_cloud_range, pillar_size):
    width = int(round((point_cloud_range[3] - point_cloud_range[0]) / pillar_size))
    height = int(round((point_cloud_range[4] - point_cloud_range[1]) / pillar_size))
    return width, height


def fg_pillar_query_and_group(xyz, xyz_batch_cnt, pt_feature,
                              point_cloud_range, pillar_size):
    # TODO(synk): FGPillarQueryAndGroup is a custom CUDA gather op; this numpy glue
    # reproduces its outputs (pillar indices [b, y, x], per-point pillar ids,
    # grouped features = [xyz - pillar_center, pt_feature]).
    xyz = np.asarray(xyz, np.float32)
    pt_feature = np.asarray(pt_feature, np.float32)
    cnts = np.asarray(xyz_batch_cnt, np.int64)
    pcr = np.asarray(point_cloud_range, np.float32)
    width, height = bev_spatial_shape(point_cloud_range, pillar_size)

    batch_idx = np.repeat(np.arange(len(cnts)), cnts).astype(np.int64)
    xi = np.clip(np.floor((xyz[:, 0] - pcr[0]) / pillar_size).astype(np.int64), 0, width - 1)
    yi = np.clip(np.floor((xyz[:, 1] - pcr[1]) / pillar_size).astype(np.int64), 0, height - 1)

    flat = batch_idx * (height * width) + yi * width + xi
    unq, inv = np.unique(flat, return_inverse=True)
    b = unq // (height * width)
    rem = unq % (height * width)
    y = rem // width
    x = rem % width
    pillar_indices = np.stack([b, y, x], axis=1).astype(np.int32)     # (M, 3) [b, y, x]

    cx = (xi.astype(np.float32) + 0.5) * pillar_size + pcr[0]
    cy = (yi.astype(np.float32) + 0.5) * pillar_size + pcr[1]
    cz = np.full_like(cx, 0.5 * (pcr[2] + pcr[5]))
    centers = np.stack([cx, cy, cz], axis=1)
    group_features = np.concatenate([xyz - centers, pt_feature], axis=1).astype(np.float32)
    return pillar_indices, inv.astype(np.int32), group_features


# ----------------------------------------------------------------------------
# Pallas kernel: fused shared-MLP (folded BN + ReLU) + segmented scatter-max
# ----------------------------------------------------------------------------
def _make_kernel(n_layers, tile_m, tile_n):
    # Doubling shifts for the segmented scan (coverage 2*max_shift >= tile_n).
    shifts = []
    s = 1
    while s < tile_n:
        shifts.append(s)
        s *= 2

    def kernel(ts_ref, nt_ref, idx_ref, idxh_ref, idxt_ref, x_ref, *rest):
        # ts_ref/nt_ref : SMEM (n_pillar_tiles,) first point-tile / #point-tiles per pillar tile
        # idx_ref       : (1, TN) int32 pillar id per point (lane-major; -1 = padding)
        # idxh_ref/_t   : (1, TN) int32 pillar id at per-tile run head / tail, else -1
        # x_ref         : (C0, TN) point features, channel-major (points on lanes)
        # rest          : per layer (W (Ck,Ck-1) bf16, bias (Ck,1) f32) ..., out_ref (TM, C_last)
        out_ref = rest[-1]
        layer_refs = rest[:-1]
        i = pl.program_id(0)   # pillar tile
        j = pl.program_id(1)   # point tile within this pillar tile's range

        @pl.when(j < nt_ref[i])
        def _compute():
            # ---- shared MLP in channel-major layout: lane-dense activations ----
            ht = x_ref[...]                                       # (C0, TN) f32
            for k in range(n_layers):
                w = layer_refs[2 * k][...]                        # (Ck, Ck-1) bf16, BN scale folded
                b = layer_refs[2 * k + 1][...]                    # (Ck, 1)   f32, folded BN bias
                ht = jnp.dot(w, ht.astype(jnp.bfloat16),
                             preferred_element_type=jnp.float32)  # (Ck, TN)
                ht = jnp.maximum(ht + b, 0.0)                     # eval-mode BN bias + ReLU, >= 0

            ids = idx_ref[...]                                    # (1, TN) int32

            # ---- segmented max along the point (lane) axis -------------------
            # Points are sorted by pillar id, so each pillar is a contiguous run.
            # log2(TN) doubling steps; afterwards the per-tile run head (or tail,
            # depending on the hardware rotate direction) holds the full run max.
            # Wrapped lanes need no mask: equal ids across the wrap imply the same
            # run (sorted ids), so spurious merges never exceed the run max.
            for sft in shifts:
                ids_s = pltpu.roll(ids, tile_n - sft, axis=1)
                ht_s = pltpu.roll(ht, tile_n - sft, axis=1)
                same = ids == ids_s                               # (1, TN)
                ht = jnp.where(same, jnp.maximum(ht, ht_s), ht)

            # ---- extract per-pillar maxima with head/tail one-hots on the MXU ----
            # Non-head/tail lanes and padding carry id -1 (never matches a row);
            # ids outside this pillar tile's range never match either.
            miota = jax.lax.broadcasted_iota(jnp.int32, (tile_m, tile_n), 0)
            sel_h = (miota == (idxh_ref[...] - i * tile_m)).astype(jnp.float32)
            sel_t = (miota == (idxt_ref[...] - i * tile_m)).astype(jnp.float32)
            nt_dims = (((1,), (1,)), ((), ()))                    # contract the point axis
            contrib = jnp.maximum(
                jax.lax.dot_general(sel_h, ht, nt_dims,
                                    preferred_element_type=jnp.float32),
                jax.lax.dot_general(sel_t, ht, nt_dims,
                                    preferred_element_type=jnp.float32))  # (TM, C_last)
            # Rows with no matching points get 0 -> identical to det3d's
            # zero-initialized scatter_max since h >= 0 after the terminal ReLU.

            @pl.when(j == 0)
            def _first():
                out_ref[...] = contrib                            # direct init, no read-modify-max

            @pl.when(j > 0)
            def _accumulate():
                out_ref[...] = jnp.maximum(out_ref[...], contrib)

    return kernel


def pillar_mlp_scatter_max(group_features, pillar_set_indices, num_pillars,
                           weights, biases, *, tile_m=64, tile_n=512):
    """Fused shared MLP + scatter-max over pillars.  Returns (M, C_last) float32.

    `weights` are BN-folded Linear weights, (C_in, C_out) float32; `biases` are the
    folded eval-mode BN biases, (C_out,) float32.  Relies on every layer ending in
    ReLU (activations >= 0), matching det3d's zero-initialized scatter_max.
    """
    group_features = np.asarray(group_features, np.float32)
    ids = np.asarray(pillar_set_indices, np.int64)
    n, c0 = group_features.shape
    n_layers = len(weights)
    c_last = int(np.asarray(weights[-1]).shape[1])

    if num_pillars <= 0 or n == 0:          # degenerate scene guard
        return jnp.zeros((max(num_pillars, 0), c_last), jnp.float32)

    # Sort points by pillar id (host glue, like the grouping itself).
    order = np.argsort(ids, kind="stable")
    ids_s = ids[order]
    x_s = group_features[order]

    m_pad = int(-(-num_pillars // tile_m) * tile_m)
    n_pad = int(max(tile_n, -(-n // tile_n) * tile_n))
    n_pt_tiles = n_pad // tile_n
    n_pl_tiles = m_pad // tile_m
    c0_pad = int(-(-c0 // 8) * 8)            # sublane-align the input channel count

    # Channel-major point features: (C0, N) with points on the lane axis.
    xt = np.zeros((c0_pad, n_pad), np.float32)
    xt[:c0, :n] = x_s.T

    # Lane-major per-point pillar ids; -1 marks padding (never matches a row).
    ids_pad = np.full(n_pad, -1, np.int64)
    ids_pad[:n] = ids_s
    idx = ids_pad.astype(np.int32).reshape(1, n_pad)

    # Per-point-tile run heads / tails of the sorted ids (host-side): after the
    # in-kernel segmented scan, the head (or tail) holds the tile's partial max.
    pos = np.arange(n_pad)
    head = np.empty(n_pad, bool)
    head[0] = True
    head[1:] = ids_pad[1:] != ids_pad[:-1]
    head |= (pos % tile_n) == 0
    tail = np.empty(n_pad, bool)
    tail[-1] = True
    tail[:-1] = ids_pad[:-1] != ids_pad[1:]
    tail |= (pos % tile_n) == (tile_n - 1)
    idx_h = np.where(head, ids_pad, -1).astype(np.int32).reshape(1, n_pad)
    idx_t = np.where(tail, ids_pad, -1).astype(np.int32).reshape(1, n_pad)

    # Per pillar tile: first point-tile and number of point-tiles covering it.
    tile_lo = np.arange(n_pl_tiles, dtype=np.int64) * tile_m
    starts = np.searchsorted(ids_s, tile_lo, side="left")
    ends = np.searchsorted(ids_s, tile_lo + tile_m, side="left")
    t_start = starts // tile_n
    t_end = np.where(ends > starts, -(-ends // tile_n), t_start)
    nt = np.maximum(t_end - t_start, 1).astype(np.int32)
    ts = np.minimum(t_start, n_pt_tiles - 1).astype(np.int32)
    inner = int(nt.max())                    # bigger tiles flatten nt -> less grid padding

    def _pt_tile(i, j, ts_ref, nt_ref):
        # Clamp to this pillar tile's last valid point tile so skipped steps
        # re-request the same block (no extra DMA) and never go out of bounds.
        last = ts_ref[i] + jnp.maximum(nt_ref[i] - 1, 0)
        return jnp.minimum(jnp.minimum(ts_ref[i] + j, last), n_pt_tiles - 1)

    def _lane_spec():
        return pl.BlockSpec(
            (1, tile_n),
            lambda i, j, ts_ref, nt_ref: (0, _pt_tile(i, j, ts_ref, nt_ref)))

    in_specs = [
        _lane_spec(),            # ids
        _lane_spec(),            # run-head ids
        _lane_spec(),            # run-tail ids
        # NOTE: add pipeline_mode=pl.Buffered(3) here if the x DMA becomes exposed.
        pl.BlockSpec((c0_pad, tile_n),
                     lambda i, j, ts_ref, nt_ref: (0, _pt_tile(i, j, ts_ref, nt_ref))),
    ]
    args = [jnp.asarray(idx), jnp.asarray(idx_h), jnp.asarray(idx_t), jnp.asarray(xt)]
    for k, (w, b) in enumerate(zip(weights, biases)):
        wt = np.asarray(w, np.float32).T                          # (C_out, C_in)
        if k == 0 and wt.shape[1] != c0_pad:
            wt = np.pad(wt, ((0, 0), (0, c0_pad - wt.shape[1])))  # zero-padded inputs
        bt = np.asarray(b, np.float32).reshape(-1, 1)             # (C_out, 1)
        in_specs.append(pl.BlockSpec(tuple(int(d) for d in wt.shape),
                                     lambda i, j, ts_ref, nt_ref: (0, 0)))
        in_specs.append(pl.BlockSpec(tuple(int(d) for d in bt.shape),
                                     lambda i, j, ts_ref, nt_ref: (0, 0)))
        args += [jnp.asarray(wt, jnp.bfloat16), jnp.asarray(bt, jnp.float32)]

    out = pl.pallas_call(
        _make_kernel(n_layers, tile_m, tile_n),
        out_shape=jax.ShapeDtypeStruct((m_pad, c_last), jnp.float32),
        grid_spec=pltpu.PrefetchScalarGridSpec(
            num_scalar_prefetch=2,
            grid=(n_pl_tiles, inner),
            in_specs=in_specs,
            out_specs=pl.BlockSpec((tile_m, c_last),
                                   lambda i, j, ts_ref, nt_ref: (i, 0)),
        ),
        # Pillar tiles own disjoint output blocks -> safe to shard the leading
        # axis across TensorCores; the point axis carries the accumulator.
        compiler_params=pltpu.CompilerParams(
            dimension_semantics=("parallel", "arbitrary")),
    )(jnp.asarray(ts), jnp.asarray(nt), *args)
    return out[:num_pillars]


# ----------------------------------------------------------------------------
# Module wrapper (parameters + forward)
# ----------------------------------------------------------------------------
def init_fg_pillar_params(mlps, key, eps=1e-3):
    """Deterministic synthetic parameters for shared_mlps (Linear/BN per layer)."""
    n_layers = len(mlps) - 1
    keys = jax.random.split(key, n_layers)
    weights, bn_scales, bn_biases = [], [], []
    for k in range(n_layers):
        fan_in, fan_out = mlps[k], mlps[k + 1]
        std = (2.0 / (fan_in + fan_out)) ** 0.5           # xavier-normal-style
        weights.append(std * jax.random.normal(keys[k], (fan_in, fan_out), jnp.float32))
        gamma = jnp.ones((fan_out,), jnp.float32)
        beta = jnp.zeros((fan_out,), jnp.float32)
        running_mean = jnp.zeros((fan_out,), jnp.float32)
        running_var = jnp.ones((fan_out,), jnp.float32)
        scale = gamma / jnp.sqrt(running_var + eps)       # folded eval-mode BN
        bias = beta - running_mean * scale
        bn_scales.append(scale)
        bn_biases.append(bias)
    return weights, bn_scales, bn_biases


def fold_bn_into_linear(weights, bn_scales, bn_biases):
    """y = relu((x @ W) * s + b) == relu(x @ (W * s) + b)  (eval-mode BN fold)."""
    folded_w, biases = [], []
    for w, s, b in zip(weights, bn_scales, bn_biases):
        folded_w.append((w * s[None, :]).astype(jnp.float32))
        biases.append(b.astype(jnp.float32))
    return folded_w, biases


def fg_pillar_max_pooling_forward(xyz, xyz_batch_cnt, pt_feature,
                                  point_cloud_range, pillar_size,
                                  weights, bn_scales, bn_biases,
                                  tile_m=64, tile_n=512):
    batch_size = int(np.asarray(xyz_batch_cnt).shape[0])
    bev_width, bev_height = bev_spatial_shape(point_cloud_range, pillar_size)
    pillar_indices, pillar_set_indices, group_features = fg_pillar_query_and_group(
        xyz, xyz_batch_cnt, pt_feature, point_cloud_range, pillar_size)
    num_pillars = int(pillar_indices.shape[0])

    w_folded, biases = fold_bn_into_linear(weights, bn_scales, bn_biases)
    features = pillar_mlp_scatter_max(
        group_features, pillar_set_indices, num_pillars,
        w_folded, biases, tile_m=tile_m, tile_n=tile_n)

    # TODO(synk): spconv.SparseConvTensor has no Pallas equivalent; return its fields.
    sparse_tensor = {
        "features": features,                      # (M, C_out)
        "indices": jnp.asarray(pillar_indices),    # (M, 3) [b, y, x]
        "spatial_shape": (bev_height, bev_width),
        "batch_size": batch_size,
    }
    return sparse_tensor


# ----------------------------------------------------------------------------
# Demo / self-test
# ----------------------------------------------------------------------------
if __name__ == "__main__":
    key = jax.random.PRNGKey(0)
    k_xyz, k_feat, k_params = jax.random.split(key, 3)

    point_cloud_range = [0.0, 0.0, -3.0, 8.0, 8.0, 1.0]
    pillar_size = 0.5                       # -> 16 x 16 BEV grid
    n_per_batch = [180, 180]                # B = 2, N = 360 points
    c_pt = 6
    mlps = [9, 16, 32]                      # C_in = 3 (xyz offsets) + 6 (point feats)

    u = np.asarray(jax.random.uniform(k_xyz, (sum(n_per_batch), 3), jnp.float32))
    xyz = np.stack([u[:, 0] * 8.0, u[:, 1] * 8.0, u[:, 2] * 4.0 - 3.0], axis=1)
    pt_feature = np.asarray(jax.random.normal(k_feat, (sum(n_per_batch), c_pt), jnp.float32))
    xyz_batch_cnt = np.asarray(n_per_batch, np.int32)

    weights, bn_scales, bn_biases = init_fg_pillar_params(mlps, k_params, eps=1e-3)

    out = fg_pillar_max_pooling_forward(
        xyz, xyz_batch_cnt, pt_feature, point_cloud_range, pillar_size,
        weights, bn_scales, bn_biases, tile_m=64, tile_n=512)
    features = jax.block_until_ready(out["features"])

    # Pure-JAX reference of the same forward (same folded / bf16-operand math).
    pillar_indices, pillar_set_indices, group_features = fg_pillar_query_and_group(
        xyz, xyz_batch_cnt, pt_feature, point_cloud_range, pillar_size)
    num_pillars = int(pillar_indices.shape[0])
    w_folded, biases = fold_bn_into_linear(weights, bn_scales, bn_biases)
    h = jnp.asarray(group_features, jnp.float32)
    for w, b in zip(w_folded, biases):
        h = jnp.maximum(
            jnp.dot(h.astype(jnp.bfloat16), jnp.asarray(w, jnp.bfloat16),
                    preferred_element_type=jnp.float32) + b[None, :], 0.0)
    ref = jax.ops.segment_max(h, jnp.asarray(pillar_set_indices, jnp.int32),
                              num_segments=num_pillars)
    ref = jnp.maximum(ref, 0.0)             # det3d's scatter_max output is zero-initialized

    np.testing.assert_allclose(np.asarray(features), np.asarray(ref),
                               rtol=1e-4, atol=1e-4)
    print("KERNEL_OK")
</pallas_src>

<mosaic_0001>
module attributes {stable_mosaic.version = 11 : i64} {
  func.func @kernel(%arg0: i32, %arg1: i32, %arg2: memref<5xi32, #tpu.memory_space<smem>>, %arg3: memref<5xi32, #tpu.memory_space<smem>>, %arg4: memref<1x512xi32, #tpu.memory_space<vmem>>, %arg5: memref<1x512xi32, #tpu.memory_space<vmem>>, %arg6: memref<1x512xi32, #tpu.memory_space<vmem>>, %arg7: memref<16x512xf32, #tpu.memory_space<vmem>>, %arg8: memref<16x16xbf16, #tpu.memory_space<vmem>>, %arg9: memref<16x1xf32, #tpu.memory_space<vmem>>, %arg10: memref<32x16xbf16, #tpu.memory_space<vmem>>, %arg11: memref<32x1xf32, #tpu.memory_space<vmem>>, %arg12: memref<64x32xf32, #tpu.memory_space<vmem>>) attributes {dimension_semantics = [#tpu.dimension_semantics<parallel>, #tpu.dimension_semantics<arbitrary>], iteration_bounds = array<i64: 5, 1>, scalar_prefetch = 2 : i64, scratch_operands = 0 : i64, tpu.core_type = #tpu.core_type<tc>, window_params = [{transform_indices = @transform_0, window_bounds = array<i64: 1, 512>}, {transform_indices = @transform_1, window_bounds = array<i64: 1, 512>}, {transform_indices = @transform_2, window_bounds = array<i64: 1, 512>}, {transform_indices = @transform_3, window_bounds = array<i64: 16, 512>}, {pipeline_mode = #tpu.pipeline_mode<synchronous>, transform_indices = @transform_4, window_bounds = array<i64: 16, 16>}, {pipeline_mode = #tpu.pipeline_mode<synchronous>, transform_indices = @transform_5, window_bounds = array<i64: 16, 1>}, {pipeline_mode = #tpu.pipeline_mode<synchronous>, transform_indices = @transform_6, window_bounds = array<i64: 32, 16>}, {pipeline_mode = #tpu.pipeline_mode<synchronous>, transform_indices = @transform_7, window_bounds = array<i64: 32, 1>}, {transform_indices = @transform_8, window_bounds = array<i64: 64, 32>}]} {
    %0 = arith.index_cast %arg0 : i32 to index
    %1 = memref.load %arg3[%0] : memref<5xi32, #tpu.memory_space<smem>>
    %2 = arith.cmpi slt, %arg1, %1 : i32
    %3 = arith.extui %2 : i1 to i32
    %c0_i32 = arith.constant 0 : i32
    %4 = arith.cmpi ne, %3, %c0_i32 : i32
    scf.if %4 {
      %c0 = arith.constant 0 : index
      %c0_0 = arith.constant 0 : index
      %5 = vector.load %arg7[%c0, %c0_0] : memref<16x512xf32, #tpu.memory_space<vmem>>, vector<16x512xf32>
      %c0_1 = arith.constant 0 : index
      %c0_2 = arith.constant 0 : index
      %6 = vector.load %arg8[%c0_1, %c0_2] : memref<16x16xbf16, #tpu.memory_space<vmem>>, vector<16x16xbf16>
      %c0_3 = arith.constant 0 : index
      %c0_4 = arith.constant 0 : index
      %7 = vector.load %arg9[%c0_3, %c0_4] : memref<16x1xf32, #tpu.memory_space<vmem>>, vector<16x1xf32>
      %8 = arith.truncf %5 : vector<16x512xf32> to vector<16x512xbf16>
      %cst = arith.constant dense<0.000000e+00> : vector<16x512xf32>
      %9 = tpu.matmul %6, %8, %cst {dimension_numbers = #tpu.dot_dimension_numbers<[1], [0], [0], [1], [0, 0, 1, 1], [], []>} : vector<16x16xbf16>, vector<16x512xbf16>, vector<16x512xf32> -> vector<16x512xf32>
      %10 = vector.broadcast %7 : vector<16x1xf32> to vector<16x512xf32>
      %11 = arith.addf %9, %10 : vector<16x512xf32>
      %cst_5 = arith.constant 0.000000e+00 : f32
      %12 = vector.broadcast %cst_5 : f32 to vector<16x512xf32>
      %13 = arith.maximumf %11, %12 : vector<16x512xf32>
      %c0_6 = arith.constant 0 : index
      %c0_7 = arith.constant 0 : index
      %14 = vector.load %arg10[%c0_6, %c0_7] : memref<32x16xbf16, #tpu.memory_space<vmem>>, vector<32x16xbf16>
      %c0_8 = arith.constant 0 : index
      %c0_9 = arith.constant 0 : index
      %15 = vector.load %arg11[%c0_8, %c0_9] : memref<32x1xf32, #tpu.memory_space<vmem>>, vector<32x1xf32>
      %16 = arith.truncf %13 : vector<16x512xf32> to vector<16x512xbf16>
      %cst_10 = arith.constant dense<0.000000e+00> : vector<32x512xf32>
      %17 = tpu.matmul %14, %16, %cst_10 {dimension_numbers = #tpu.dot_dimension_numbers<[1], [0], [0], [1], [0, 0, 1, 1], [], []>} : vector<32x16xbf16>, vector<16x512xbf16>, vector<32x512xf32> -> vector<32x512xf32>
      %18 = vector.broadcast %15 : vector<32x1xf32> to vector<32x512xf32>
      %19 = arith.addf %17, %18 : vector<32x512xf32>
      %cst_11 = arith.constant 0.000000e+00 : f32
      %20 = vector.broadcast %cst_11 : f32 to vector<32x512xf32>
      %21 = arith.maximumf %19, %20 : vector<32x512xf32>
      %c0_12 = arith.constant 0 : index
      %c0_13 = arith.constant 0 : index
      %22 = vector.load %arg4[%c0_12, %c0_13] : memref<1x512xi32, #tpu.memory_space<vmem>>, vector<1x512xi32>
      %c511_i32 = arith.constant 511 : i32
      %23 = tpu.dynamic_rotate %22 by %c511_i32 dim 1 : vector<1x512xi32>, i32 -> vector<1x512xi32>
      %c511_i32_14 = arith.constant 511 : i32
      %24 = tpu.dynamic_rotate %21 by %c511_i32_14 dim 1 : vector<32x512xf32>, i32 -> vector<32x512xf32>
      %25 = arith.cmpi eq, %22, %23 : vector<1x512xi32>
      %26 = arith.maximumf %21, %24 : vector<32x512xf32>
      %27 = vector.shape_cast %25 : vector<1x512xi1> to vector<1x512xi1>
      %28 = vector.broadcast %27 : vector<1x512xi1> to vector<32x512xi1>
      %29 = arith.select %28, %26, %21 : vector<32x512xi1>, vector<32x512xf32>
      %c510_i32 = arith.constant 510 : i32
      %30 = tpu.dynamic_rotate %22 by %c510_i32 dim 1 : vector<1x512xi32>, i32 -> vector<1x512xi32>
      %c510_i32_15 = arith.constant 510 : i32
      %31 = tpu.dynamic_rotate %29 by %c510_i32_15 dim 1 : vector<32x512xf32>, i32 -> vector<32x512xf32>
      %32 = arith.cmpi eq, %22, %30 : vector<1x512xi32>
      %33 = arith.maximumf %29, %31 : vector<32x512xf32>
      %34 = vector.shape_cast %32 : vector<1x512xi1> to vector<1x512xi1>
      %35 = vector.broadcast %34 : vector<1x512xi1> to vector<32x512xi1>
      %36 = arith.select %35, %33, %29 : vector<32x512xi1>, vector<32x512xf32>
      %c508_i32 = arith.constant 508 : i32
      %37 = tpu.dynamic_rotate %22 by %c508_i32 dim 1 : vector<1x512xi32>, i32 -> vector<1x512xi32>
      %c508_i32_16 = arith.constant 508 : i32
      %38 = tpu.dynamic_rotate %36 by %c508_i32_16 dim 1 : vector<32x512xf32>, i32 -> vector<32x512xf32>
      %39 = arith.cmpi eq, %22, %37 : vector<1x512xi32>
      %40 = arith.maximumf %36, %38 : vector<32x512xf32>
      %41 = vector.shape_cast %39 : vector<1x512xi1> to vector<1x512xi1>
      %42 = vector.broadcast %41 : vector<1x512xi1> to vector<32x512xi1>
      %43 = arith.select %42, %40, %36 : vector<32x512xi1>, vector<32x512xf32>
      %c504_i32 = arith.constant 504 : i32
      %44 = tpu.dynamic_rotate %22 by %c504_i32 dim 1 : vector<1x512xi32>, i32 -> vector<1x512xi32>
      %c504_i32_17 = arith.constant 504 : i32
      %45 = tpu.dynamic_rotate %43 by %c504_i32_17 dim 1 : vector<32x512xf32>, i32 -> vector<32x512xf32>
      %46 = arith.cmpi eq, %22, %44 : vector<1x512xi32>
      %47 = arith.maximumf %43, %45 : vector<32x512xf32>
      %48 = vector.shape_cast %46 : vector<1x512xi1> to vector<1x512xi1>
      %49 = vector.broadcast %48 : vector<1x512xi1> to vector<32x512xi1>
      %50 = arith.select %49, %47, %43 : vector<32x512xi1>, vector<32x512xf32>
      %c496_i32 = arith.constant 496 : i32
      %51 = tpu.dynamic_rotate %22 by %c496_i32 dim 1 : vector<1x512xi32>, i32 -> vector<1x512xi32>
      %c496_i32_18 = arith.constant 496 : i32
      %52 = tpu.dynamic_rotate %50 by %c496_i32_18 dim 1 : vector<32x512xf32>, i32 -> vector<32x512xf32>
      %53 = arith.cmpi eq, %22, %51 : vector<1x512xi32>
      %54 = arith.maximumf %50, %52 : vector<32x512xf32>
      %55 = vector.shape_cast %53 : vector<1x512xi1> to vector<1x512xi1>
      %56 = vector.broadcast %55 : vector<1x512xi1> to vector<32x512xi1>
      %57 = arith.select %56, %54, %50 : vector<32x512xi1>, vector<32x512xf32>
      %c480_i32 = arith.constant 480 : i32
      %58 = tpu.dynamic_rotate %22 by %c480_i32 dim 1 : vector<1x512xi32>, i32 -> vector<1x512xi32>
      %c480_i32_19 = arith.constant 480 : i32
      %59 = tpu.dynamic_rotate %57 by %c480_i32_19 dim 1 : vector<32x512xf32>, i32 -> vector<32x512xf32>
      %60 = arith.cmpi eq, %22, %58 : vector<1x512xi32>
      %61 = arith.maximumf %57, %59 : vector<32x512xf32>
      %62 = vector.shape_cast %60 : vector<1x512xi1> to vector<1x512xi1>
      %63 = vector.broadcast %62 : vector<1x512xi1> to vector<32x512xi1>
      %64 = arith.select %63, %61, %57 : vector<32x512xi1>, vector<32x512xf32>
      %c448_i32 = arith.constant 448 : i32
      %65 = tpu.dynamic_rotate %22 by %c448_i32 dim 1 : vector<1x512xi32>, i32 -> vector<1x512xi32>
      %c448_i32_20 = arith.constant 448 : i32
      %66 = tpu.dynamic_rotate %64 by %c448_i32_20 dim 1 : vector<32x512xf32>, i32 -> vector<32x512xf32>
      %67 = arith.cmpi eq, %22, %65 : vector<1x512xi32>
      %68 = arith.maximumf %64, %66 : vector<32x512xf32>
      %69 = vector.shape_cast %67 : vector<1x512xi1> to vector<1x512xi1>
      %70 = vector.broadcast %69 : vector<1x512xi1> to vector<32x512xi1>
      %71 = arith.select %70, %68, %64 : vector<32x512xi1>, vector<32x512xf32>
      %c384_i32 = arith.constant 384 : i32
      %72 = tpu.dynamic_rotate %22 by %c384_i32 dim 1 : vector<1x512xi32>, i32 -> vector<1x512xi32>
      %c384_i32_21 = arith.constant 384 : i32
      %73 = tpu.dynamic_rotate %71 by %c384_i32_21 dim 1 : vector<32x512xf32>, i32 -> vector<32x512xf32>
      %74 = arith.cmpi eq, %22, %72 : vector<1x512xi32>
      %75 = arith.maximumf %71, %73 : vector<32x512xf32>
      %76 = vector.shape_cast %74 : vector<1x512xi1> to vector<1x512xi1>
      %77 = vector.broadcast %76 : vector<1x512xi1> to vector<32x512xi1>
      %78 = arith.select %77, %75, %71 : vector<32x512xi1>, vector<32x512xf32>
      %c256_i32 = arith.constant 256 : i32
      %79 = tpu.dynamic_rotate %22 by %c256_i32 dim 1 : vector<1x512xi32>, i32 -> vector<1x512xi32>
      %c256_i32_22 = arith.constant 256 : i32
      %80 = tpu.dynamic_rotate %78 by %c256_i32_22 dim 1 : vector<32x512xf32>, i32 -> vector<32x512xf32>
      %81 = arith.cmpi eq, %22, %79 : vector<1x512xi32>
      %82 = arith.maximumf %78, %80 : vector<32x512xf32>
      %83 = vector.shape_cast %81 : vector<1x512xi1> to vector<1x512xi1>
      %84 = vector.broadcast %83 : vector<1x512xi1> to vector<32x512xi1>
      %85 = arith.select %84, %82, %78 : vector<32x512xi1>, vector<32x512xf32>
      %86 = tpu.iota {dimensions = array<i32: 0>} : vector<64x512xi32>
      %c0_23 = arith.constant 0 : index
      %c0_24 = arith.constant 0 : index
      %87 = vector.load %arg5[%c0_23, %c0_24] : memref<1x512xi32, #tpu.memory_space<vmem>>, vector<1x512xi32>
      %c64_i32 = arith.constant 64 : i32
      %88 = arith.muli %arg0, %c64_i32 : i32
      %89 = vector.broadcast %88 : i32 to vector<1x512xi32>
      %90 = arith.subi %87, %89 : vector<1x512xi32>
      %91 = vector.broadcast %90 : vector<1x512xi32> to vector<64x512xi32>
      %92 = arith.cmpi eq, %86, %91 : vector<64x512xi32>
      %93 = arith.extui %92 : vector<64x512xi1> to vector<64x512xi32>
      %94 = arith.sitofp %93 : vector<64x512xi32> to vector<64x512xf32>
      %c0_25 = arith.constant 0 : index
      %c0_26 = arith.constant 0 : index
      %95 = vector.load %arg6[%c0_25, %c0_26] : memref<1x512xi32, #tpu.memory_space<vmem>>, vector<1x512xi32>
      %c64_i32_27 = arith.constant 64 : i32
      %96 = arith.muli %arg0, %c64_i32_27 : i32
      %97 = vector.broadcast %96 : i32 to vector<1x512xi32>
      %98 = arith.subi %95, %97 : vector<1x512xi32>
      %99 = vector.broadcast %98 : vector<1x512xi32> to vector<64x512xi32>
      %100 = arith.cmpi eq, %86, %99 : vector<64x512xi32>
      %101 = arith.extui %100 : vector<64x512xi1> to vector<64x512xi32>
      %102 = arith.sitofp %101 : vector<64x512xi32> to vector<64x512xf32>
      %cst_28 = arith.constant dense<0.000000e+00> : vector<64x32xf32>
      %103 = tpu.matmul %94, %85, %cst_28 {dimension_numbers = #tpu.dot_dimension_numbers<[1], [1], [0], [0], [0, 0, 1, 0], [], []>} : vector<64x512xf32>, vector<32x512xf32>, vector<64x32xf32> -> vector<64x32xf32>
      %cst_29 = arith.constant dense<0.000000e+00> : vector<64x32xf32>
      %104 = tpu.matmul %102, %85, %cst_29 {dimension_numbers = #tpu.dot_dimension_numbers<[1], [1], [0], [0], [0, 0, 1, 0], [], []>} : vector<64x512xf32>, vector<32x512xf32>, vector<64x32xf32> -> vector<64x32xf32>
      %105 = arith.maximumf %103, %104 : vector<64x32xf32>
      %c0_i32_30 = arith.constant 0 : i32
      %106 = arith.cmpi eq, %arg1, %c0_i32_30 : i32
      %107 = arith.extui %106 : i1 to i32
      %c0_i32_31 = arith.constant 0 : i32
      %108 = arith.cmpi ne, %107, %c0_i32_31 : i32
      scf.if %108 {
        %c0_34 = arith.constant 0 : index
        %c0_35 = arith.constant 0 : index
        %112 = vector.load %arg12[%c0_34, %c0_35] : memref<64x32xf32, #tpu.memory_space<vmem>>, vector<64x32xf32>
        tpu.vector_store %arg12[%c0_34, %c0_35], %105 {strides = array<i32>} : memref<64x32xf32, #tpu.memory_space<vmem>>, vector<64x32xf32>,
      } else {
      }
      %c0_i32_32 = arith.constant 0 : i32
      %109 = arith.cmpi sgt, %arg1, %c0_i32_32 : i32
      %110 = arith.extui %109 : i1 to i32
      %c0_i32_33 = arith.constant 0 : i32
      %111 = arith.cmpi ne, %110, %c0_i32_33 : i32
      scf.if %111 {
        %c0_34 = arith.constant 0 : index
        %c0_35 = arith.constant 0 : index
        %112 = vector.load %arg12[%c0_34, %c0_35] : memref<64x32xf32, #tpu.memory_space<vmem>>, vector<64x32xf32>
        %113 = arith.maximumf %112, %105 : vector<64x32xf32>
        %c0_36 = arith.constant 0 : index
        %c0_37 = arith.constant 0 : index
        %114 = vector.load %arg12[%c0_36, %c0_37] : memref<64x32xf32, #tpu.memory_space<vmem>>, vector<64x32xf32>
        tpu.vector_store %arg12[%c0_36, %c0_37], %113 {strides = array<i32>} : memref<64x32xf32, #tpu.memory_space<vmem>>, vector<64x32xf32>,
      } else {
      }
    } else {
    }
    return
  }
  func.func @transform_0(%arg0: i32, %arg1: i32, %arg2: memref<5xi32, #tpu.memory_space<smem>>, %arg3: memref<5xi32, #tpu.memory_space<smem>>) -> (i32, i32) {
    %0 = arith.index_cast %arg0 : i32 to index
    %1 = memref.load %arg2[%0] : memref<5xi32, #tpu.memory_space<smem>>
    %2 = arith.index_cast %arg0 : i32 to index
    %3 = memref.load %arg3[%2] : memref<5xi32, #tpu.memory_space<smem>>
    %c1_i32 = arith.constant 1 : i32
    %4 = arith.subi %3, %c1_i32 : i32
    %c0_i32 = arith.constant 0 : i32
    %5 = arith.maxsi %4, %c0_i32 : i32
    %6 = arith.addi %1, %5 : i32
    %7 = arith.index_cast %arg0 : i32 to index
    %8 = memref.load %arg2[%7] : memref<5xi32, #tpu.memory_space<smem>>
    %9 = arith.addi %8, %arg1 : i32
    %10 = arith.minsi %9, %6 : i32
    %c0_i32_0 = arith.constant 0 : i32
    %11 = arith.minsi %10, %c0_i32_0 : i32
    %c0_i32_1 = arith.constant 0 : i32
    %c0_i32_2 = arith.constant 0 : i32
    return %c0_i32_1, %11 : i32, i32
  }
  func.func @transform_1(%arg0: i32, %arg1: i32, %arg2: memref<5xi32, #tpu.memory_space<smem>>, %arg3: memref<5xi32, #tpu.memory_space<smem>>) -> (i32, i32) {
    %0 = arith.index_cast %arg0 : i32 to index
    %1 = memref.load %arg2[%0] : memref<5xi32, #tpu.memory_space<smem>>
    %2 = arith.index_cast %arg0 : i32 to index
    %3 = memref.load %arg3[%2] : memref<5xi32, #tpu.memory_space<smem>>
    %c1_i32 = arith.constant 1 : i32
    %4 = arith.subi %3, %c1_i32 : i32
    %c0_i32 = arith.constant 0 : i32
    %5 = arith.maxsi %4, %c0_i32 : i32
    %6 = arith.addi %1, %5 : i32
    %7 = arith.index_cast %arg0 : i32 to index
    %8 = memref.load %arg2[%7] : memref<5xi32, #tpu.memory_space<smem>>
    %9 = arith.addi %8, %arg1 : i32
    %10 = arith.minsi %9, %6 : i32
    %c0_i32_0 = arith.constant 0 : i32
    %11 = arith.minsi %10, %c0_i32_0 : i32
    %c0_i32_1 = arith.constant 0 : i32
    %c0_i32_2 = arith.constant 0 : i32
    return %c0_i32_1, %11 : i32, i32
  }
  func.func @transform_2(%arg0: i32, %arg1: i32, %arg2: memref<5xi32, #tpu.memory_space<smem>>, %arg3: memref<5xi32, #tpu.memory_space<smem>>) -> (i32, i32) {
    %0 = arith.index_cast %arg0 : i32 to index
    %1 = memref.load %arg2[%0] : memref<5xi32, #tpu.memory_space<smem>>
    %2 = arith.index_cast %arg0 : i32 to index
    %3 = memref.load %arg3[%2] : memref<5xi32, #tpu.memory_space<smem>>
    %c1_i32 = arith.constant 1 : i32
    %4 = arith.subi %3, %c1_i32 : i32
    %c0_i32 = arith.constant 0 : i32
    %5 = arith.maxsi %4, %c0_i32 : i32
    %6 = arith.addi %1, %5 : i32
    %7 = arith.index_cast %arg0 : i32 to index
    %8 = memref.load %arg2[%7] : memref<5xi32, #tpu.memory_space<smem>>
    %9 = arith.addi %8, %arg1 : i32
    %10 = arith.minsi %9, %6 : i32
    %c0_i32_0 = arith.constant 0 : i32
    %11 = arith.minsi %10, %c0_i32_0 : i32
    %c0_i32_1 = arith.constant 0 : i32
    %c0_i32_2 = arith.constant 0 : i32
    return %c0_i32_1, %11 : i32, i32
  }
  func.func @transform_3(%arg0: i32, %arg1: i32, %arg2: memref<5xi32, #tpu.memory_space<smem>>, %arg3: memref<5xi32, #tpu.memory_space<smem>>) -> (i32, i32) {
    %0 = arith.index_cast %arg0 : i32 to index
    %1 = memref.load %arg2[%0] : memref<5xi32, #tpu.memory_space<smem>>
    %2 = arith.index_cast %arg0 : i32 to index
    %3 = memref.load %arg3[%2] : memref<5xi32, #tpu.memory_space<smem>>
    %c1_i32 = arith.constant 1 : i32
    %4 = arith.subi %3, %c1_i32 : i32
    %c0_i32 = arith.constant 0 : i32
    %5 = arith.maxsi %4, %c0_i32 : i32
    %6 = arith.addi %1, %5 : i32
    %7 = arith.index_cast %arg0 : i32 to index
    %8 = memref.load %arg2[%7] : memref<5xi32, #tpu.memory_space<smem>>
    %9 = arith.addi %8, %arg1 : i32
    %10 = arith.minsi %9, %6 : i32
    %c0_i32_0 = arith.constant 0 : i32
    %11 = arith.minsi %10, %c0_i32_0 : i32
    %c0_i32_1 = arith.constant 0 : i32
    %c0_i32_2 = arith.constant 0 : i32
    return %c0_i32_1, %11 : i32, i32
  }
  func.func @transform_4(%arg0: i32, %arg1: i32, %arg2: memref<5xi32, #tpu.memory_space<smem>>, %arg3: memref<5xi32, #tpu.memory_space<smem>>) -> (i32, i32) {
    %c0_i32 = arith.constant 0 : i32
    %c0_i32_0 = arith.constant 0 : i32
    %c0_i32_1 = arith.constant 0 : i32
    return %c0_i32, %c0_i32_0 : i32, i32
  }
  func.func @transform_5(%arg0: i32, %arg1: i32, %arg2: memref<5xi32, #tpu.memory_space<smem>>, %arg3: memref<5xi32, #tpu.memory_space<smem>>) -> (i32, i32) {
    %c0_i32 = arith.constant 0 : i32
    %c0_i32_0 = arith.constant 0 : i32
    %c0_i32_1 = arith.constant 0 : i32
    return %c0_i32, %c0_i32_0 : i32, i32
  }
  func.func @transform_6(%arg0: i32, %arg1: i32, %arg2: memref<5xi32, #tpu.memory_space<smem>>, %arg3: memref<5xi32, #tpu.memory_space<smem>>) -> (i32, i32) {
    %c0_i32 = arith.constant 0 : i32
    %c0_i32_0 = arith.constant 0 : i32
    %c0_i32_1 = arith.constant 0 : i32
    return %c0_i32, %c0_i32_0 : i32, i32
  }
  func.func @transform_7(%arg0: i32, %arg1: i32, %arg2: memref<5xi32, #tpu.memory_space<smem>>, %arg3: memref<5xi32, #tpu.memory_space<smem>>) -> (i32, i32) {
    %c0_i32 = arith.constant 0 : i32
    %c0_i32_0 = arith.constant 0 : i32
    %c0_i32_1 = arith.constant 0 : i32
    return %c0_i32, %c0_i32_0 : i32, i32
  }
  func.func @transform_8(%arg0: i32, %arg1: i32, %arg2: memref<5xi32, #tpu.memory_space<smem>>, %arg3: memref<5xi32, #tpu.memory_space<smem>>) -> (i32, i32) {
    %c0_i32 = arith.constant 0 : i32
    %c0_i32_0 = arith.constant 0 : i32
    return %arg0, %c0_i32 : i32, i32
  }
}

</mosaic_0001>

<bundles_post_ra>
// kernel: tpu_custom_call.1
= control target key start
LH: loop header
LB: loop body
LE: loop exit
PB: predicated region body
PF: predicated region fallthrough
CT: control target
= control target key end

     0   :  { %s3146_s19 = smov [#allocation3]   ;;  %s3147_s20 = smov [#allocation4]   ;;  %s5265_s0 = inlined_call_operand.vmem [shape: s32[5], index: 0, kind: input, shape index: {}]   ;;  %s5266_s2 = inlined_call_operand.vmem [shape: s32[1,512], index: 2, kind: input, shape index: {}]   ;;  %s5267_s3 = inlined_call_operand.vmem [shape: s32[1,512], index: 3, kind: input, shape index: {}]   ;;  %s5268_s4 = inlined_call_operand.vmem [shape: s32[1,512], index: 4, kind: input, shape index: {}]   ;;  %s5269_s5 = inlined_call_operand.hbm [shape: f32[16,512], index: 5, kind: input, shape index: {}]   ;;  %s5270_s6 = inlined_call_operand.vmem [shape: bf16[16,16], index: 6, kind: input, shape index: {}]   ;;  %s5271_s7 = inlined_call_operand.vmem [shape: f32[16,1], index: 7, kind: input, shape index: {}]   ;;  %s5272_s8 = inlined_call_operand.vmem [shape: bf16[32,16], index: 8, kind: input, shape index: {}]   ;;  %s5273_s9 = inlined_call_operand.vmem [shape: f32[32,1], index: 9, kind: input, shape index: {}]   ;;  %s5274_s10 = inlined_call_operand.vmem [shape: f32[320,32], index: 10, kind: output, shape index: {}]   ;;  %s5275_s1 = inlined_call_operand.vmem [shape: s32[5], index: 1, kind: input, shape index: {}]  }
   0x1   :  { %s16_s15 = sshll.u32 %s5265_s0, 4  ;;  %s21_s18 = sshll.u32 %s5275_s1, 4  ;;  %s17_s15 = int_to_ptr.vmem [resolvable:$true] %s16_s15  ;;  %s22_s18 = int_to_ptr.vmem [resolvable:$true] %s21_s18 }
   0x2   :  { %19 = dma.vmem_to_smem %s17_s15, 16, %s3146_s19, [#allocation2] }
   0x3   :  { %24 = dma.vmem_to_smem %s22_s18, 16, %s3147_s20, [#allocation2] }
   0x4   :  { %3116 = dma.done.wait [#allocation2], 32 }
   0x5   :  { %3117 = vsyncadd [#allocation2], 4294967264 }
   0x6   :  { %27 = sfence }
   0x7   :  { %28 = vsyncpa [#allocation6], 0 }
   0x8   :  { %30 = vsyncpa [#allocation6 + $0x1], 0  ;;  %s3220_s21 = smov 0   ;;  %s3222_s22 = smov 0  }
   0x9   :  { %s3224_s0 = smov 0   ;;  %s3226_s23 = smov 0  }
   0xa   :  { %s3228_s1 = smov 0   ;;  %s3230_s24 = smov 0  }
   0xb LB: > { %5278 = sst [smem:[#allocation13_spill]] %s3140_s1  ;;  %s48_s25 = sadd.s32 1, %s3140_s1  ;;  %s3144_s24 = sphi %s3230_s24, %s36_s24   ;;  %s3140_s1 = sphi %s3228_s1, %s5363_s1   ;;  %s3136_s23 = sphi %s3226_s23, %s5362_s23   ;;  %s3132_s0 = sphi %s3224_s0, %s5366_s0   ;;  %s3128_s22 = sphi %s3222_s22, %s5365_s22   ;;  %s3124_s21 = sphi %s3220_s21, %s5364_s21  }
   0xc   : > { %p50_p0 = scmp.ge.s32.totalorder %s48_s25, 5  ;;  %s197_s26 = sld [smem:[#allocation4 + %s3140_s1]] }
   0xd   : > { %s2491_s27 = sadd.s32 4294967295, %s3144_s24   ;;  %s196_s28 = sld [smem:[#allocation3 + %s3140_s1]] }
   0xe   : > { %s5368_s25 = smov (%p50_p0, %s48_s25), 0  ;;  %p234_p1 = scmp.ne.s32.totalorder %s3128_s22, %s3124_s21 }
   0xf   : > { %5279 = sst [smem:[#allocation14_spill]] %s5368_s25  ;;  %p235_p2 = scmp.eq.s32.totalorder %s2491_s27, 0 }
  0x10   : > { %s208_s29 = sld [smem:[#allocation4 + %s5368_s25]]  ;;  %p228_p5 = scmp.ne.s32.totalorder %s3132_s0, %s3128_s22 }
  0x11   : > { %s207_s11 = sld [smem:[#allocation3 + %s5368_s25]]  ;;  %p3257_p4 = por %p235_p2, %p234_p1 }
  0x12   : > { %s2499_s30 = sadd.s32 4294967295, %s197_s26  ;;  %p229_p6 = scmp.eq.s32.totalorder %s3144_s24, 0 }
  0x13   : > { %p199_p3 = scmp.gt.s32.totalorder %s2499_s30, 0  ;;  %p2692_p10 = scmp.lt.s32.totalorder %s3144_s24, 5 }
  0x14   : > { %p3264_p9 = por %p229_p6, %p228_p5  ;;  %s221_s20 = sadd.s32 1, %s3132_s0 }
  0x15   : > { %s5370_s30 = smov (!%p199_p3, %s2499_s30), 0  ;;  %p2507_p2 = scmp.ge.s32.totalorder %s3144_s24, 1 }
  0x16   : > { %s2500_s13 = sadd.s32 4294967295, %s208_s29  ;;  %s201_s14 = sadd.s32 %s5370_s30, %s196_s28 }
  0x17   : > { %p210_p7 = scmp.gt.s32.totalorder %s2500_s13, 0  ;;  %p203_p8 = scmp.lt.s32.totalorder %s196_s28, %s201_s14 }
  0x18   : > { %s2678_s17 = scalar_select %p3264_p9, [#allocation3], [#allocation7] }
  0x19   : > { %s5372_s13 = smov (!%p210_p7, %s2500_s13), 0  ;;  %s5374_s28 = smov (!%p203_p8, %s196_s28), %s201_s14 }
  0x1a   : > { %s212_s16 = sadd.s32 %s5372_s13, %s207_s11  ;;  %p205_p11 = scmp.lt.s32.totalorder %s5374_s28, 0 }
  0x1b   : > { %p214_p12 = scmp.lt.s32.totalorder %s207_s11, %s212_s16  ;;  %s5380_s17 = smov (!%p2692_p10, %s2678_s17), [#allocation9] }
  0x1c   : > { %s5376_s28 = smov (!%p205_p11, %s5374_s28), 0  ;;  %p3283_p1 = pnand %p2692_p10, %p3264_p9 }
  0x1d   : > { %s5378_s11 = smov (!%p214_p12, %s207_s11), %s212_s16  ;;  %p501_p3 = scmp.lt.s32.totalorder %s3144_s24, 6 }
  0x1e   : > { %s2679_s18 = scalar_select %p3264_p9, %s3140_s1, 0 }
  0x1f   : > { %p216_p13 = scmp.lt.s32.totalorder %s5378_s11, 0  ;;  %p3296_p5 = pnand %p2507_p2, %p501_p3 }
  0x20   : > { %s5384_s18 = smov (!%p2692_p10, %s2679_s18), 0  ;;  %s470_s13 = sand.u32 1, %s3132_s0  }
  0x21   : > { %s5382_s11 = smov (!%p216_p13, %s5378_s11), 0  ;;  %s475_s30 = sld [smem:[%s5380_s17 + %s5384_s18]] }
  0x22   : > { %s218_s19 = ssub.s32 %s5376_s28, %s5382_s11  ;;  %s2503_s14 = sshll.u32 %s470_s13, 6 }
  0x23   : > { %p219_p0 = scmp.eq.s32.totalorder %s218_s19, 0  ;;  %s474_s15 = scalar_lea.vmem [#allocation5], %s2503_s14 }
  0x24   : > { %s2680_s26 = scalar_select %p3264_p9, [#allocation4], [#allocation8] }
  0x25   : > { %s3290_s27 = scalar_select %p219_p0, %s3132_s0, %s221_s20  }
  0x26   : > { %s5386_s26 = smov (!%p2692_p10, %s2680_s26), [#allocation10]  ;;  %s493_s19 = sshll.u32 %s474_s15, 4  ;;  %s494_s19 = int_to_ptr.vmem [resolvable:$true] %s493_s19 }
  0x27   : > { %5283 = sst [smem:[#allocation15_spill]] %s3290_s27  ;;  %p3066_p10 = pneg %p3283_p1 }
  0x28   : > { %s476_s29 = sld [smem:[%s5386_s26 + %s5384_s18]] }
  0x2e   : > { %s2504_s11 = sadd.s32 4294967295, %s476_s29  ;;  %s471_s29 = scalar_lea.sflag [#allocation6], %s470_s13 }
  0x2f   : > { %p478_p6 = scmp.gt.s32.totalorder %s2504_s11, 0 }
  0x31   : > { %s5388_s11 = smov (!%p478_p6, %s2504_s11), 0 }
  0x32   : > { %s480_s16 = sadd.s32 %s5388_s11, %s475_s30 }
  0x33   : > { %p482_p7 = scmp.lt.s32.totalorder %s475_s30, %s480_s16 }
  0x35   : > { %s5390_s30 = smov (!%p482_p7, %s475_s30), %s480_s16  ;;  %s3069_s16 = scalar_lea.hbm %s5269_s5, 64 }
  0x36   : > { %p484_p8 = scmp.lt.s32.totalorder %s5390_s30, 0 }
  0x38   : > { %s5392_s30 = smov (!%p484_p8, %s5390_s30), 0 }
  0x39   : > { %s2674_s20 = sshll.u32 %s5392_s30, 5 }
  0x3a   : > { %s490_s26 = scalar_lea.hbm %s5269_s5, %s2674_s20 }
  0x3b   : > { %s491_s25 = sshll.u32 %s490_s26, 4  ;;  %s492_s25 = int_to_ptr.hbm [resolvable:$true] %s491_s25 }
  0x3c   : > { %s3062_s1 = sshra.s32 %s492_s25, 4  ;;  %s3063_s1 = int_to_ptr.hbm [resolvable:$true] %s3062_s1 }
  0x3d   : > { %s3064_s27 = scalar_lea.hbm %s3063_s1, 64  ;;  %p3070_p13 = scmp.lt.s32.totalorder %s3063_s1, %s5269_s5 }
  0x3e   : > { %p3065_p9 = scmp.ne.s32.totalorder %s3063_s1, %s3064_s27  ;;  %p3071_p0 = scmp.lt.s32.totalorder %s3069_s16, %s3064_s27 }
  0x40   : > { %p3067_p11 = pnand %p3066_p10, %p3065_p9  ;;  %p3072_p2 = por %p3071_p0, %p3070_p13 }
  0x42   : > { %p3068_p12 = pneg %p3067_p11 }
  0x44   : > { %p3073_p3 = pnand %p3072_p2, %p3068_p12 }
  0x46   : > { %3076 = shalt.err (!%p3073_p3)
}
  0x47   : > { %s3148_s13 = smov 512   ;;  %s3149_s20 = smov 32  }
  0x48   : > { %2691 = dma.hbm_to_vmem [thread:$0]  (!%p3283_p1), %s492_s25, 1024, %s494_s19, %s471_s29, %s3148_s13, %s3148_s13, %s3149_s20  }
  0x49   : > { %505 = sbr.rel (%p3296_p5) target bundleno = 1570 (0x622), region = 52  ;;  %s507_s17 = sand.u32 (!%p3296_p5), 1, %s3128_s22  }
  0x4a   : > { %s2508_s18 = sshll.u32 (!%p3296_p5), %s507_s17, 6  ;;  %s508_s26 = scalar_lea.sflag (!%p3296_p5), [#allocation6], %s507_s17 }
  0x4b   : > { %s3317_s11 = scalar_lea.vmem (!%p3296_p5), [#allocation5], %s2508_s18 }
  0x4e   : > { %3119 = dma.done.wait (%p3257_p4), %s508_s26, 1024  }
  0x4f   : > { %3121 = vsyncadd (%p3257_p4), %s508_s26, 4294966272  ;;  %s591_s1 = sld [smem:[#allocation4 + %s3136_s23]]  ;;  %s2515_s17 = sshll.u32 %s3136_s23, 3 }
  0x50   : > { %s618_s25 = sld [smem:[#allocation4 + %s3136_s23]]  ;;  %p684_p13 = scmp.lt.s32.totalorder %s2515_s17, 39 }
  0x51   : > { %s590_s21 = sld [smem:[#allocation3 + %s3136_s23]] }
  0x52   : > { %s645_s27 = sld [smem:[#allocation4 + %s3136_s23]]  ;;  %s5416_s17 = smov (!%p684_p13, %s2515_s17), 39 }
  0x53   : > { %s3328_s28 = sld [smem:[#allocation4 + %s3136_s23]] }
  0x54   : > { %s617_s29 = sld [smem:[#allocation3 + %s3136_s23]] }
  0x55   : > { %s2509_s19 = sadd.s32 4294967295, %s591_s1  ;;  %s644_s30 = sld [smem:[#allocation3 + %s3136_s23]] }
  0x56   : > { %p593_p1 = scmp.gt.s32.totalorder %s2509_s19, 0  ;;  %s2511_s14 = sadd.s32 4294967295, %s618_s25 }
  0x57   : > { %p620_p5 = scmp.gt.s32.totalorder %s2511_s14, 0 }
  0x58   : > { %s5394_s19 = smov (!%p593_p1, %s2509_s19), 0  ;;  %s2513_s12 = sadd.s32 4294967295, %s645_s27 }
  0x59   : > { %s595_s16 = sadd.s32 %s5394_s19, %s590_s21  ;;  %p647_p6 = scmp.gt.s32.totalorder %s2513_s12, 0 }
  0x5a   : > { %p597_p4 = scmp.lt.s32.totalorder %s590_s21, %s595_s16  ;;  %s5396_s14 = smov (!%p620_p5, %s2511_s14), 0 }
  0x5b   : > { %s622_s15 = sadd.s32 %s5396_s14, %s617_s29  ;;  %s5400_s12 = smov (!%p647_p6, %s2513_s12), 0 }
  0x5c   : > { %s5398_s21 = smov (!%p597_p4, %s590_s21), %s595_s16  ;;  %p624_p8 = scmp.lt.s32.totalorder %s617_s29, %s622_s15 }
  0x5d   : > { %p599_p7 = scmp.lt.s32.totalorder %s5398_s21, 0  ;;  %s649_s20 = sadd.s32 %s5400_s12, %s644_s30 }
  0x5e   : > { %s5404_s29 = smov (!%p624_p8, %s617_s29), %s622_s15  ;;  %p651_p11 = scmp.lt.s32.totalorder %s644_s30, %s649_s20 }
  0x5f   : > { %s5402_s21 = smov (!%p599_p7, %s5398_s21), 0  ;;  %p626_p10 = scmp.lt.s32.totalorder %s5404_s29, 0 }
  0x60   : > { %s2510_s13 = sshll.u32 %s5402_s21, 2  ;;  %s5410_s30 = smov (!%p651_p11, %s644_s30), %s649_s20 }
  0x61   : > { %p602_p9 = scmp.lt.s32.totalorder %s2510_s13, 3  ;;  %s5408_s29 = smov (!%p626_p10, %s5404_s29), 0 }
  0x62   : > { %s2512_s25 = sshll.u32 %s5408_s29, 2  ;;  %p653_p0 = scmp.lt.s32.totalorder %s5410_s30, 0 }
  0x63   : > { %s5406_s13 = smov (!%p602_p9, %s2510_s13), 3  ;;  %p629_p12 = scmp.lt.s32.totalorder %s2512_s25, 3 }
  0x64   : > { %s3336_s1 = scalar_lea.vmem %s5266_s2, %s5406_s13  ;;  %s5414_s30 = smov (!%p653_p0, %s5410_s30), 0 }
  0x65   : > { %s5412_s25 = smov (!%p629_p12, %s2512_s25), 3  ;;  %s2514_s14 = sshll.u32 %s5414_s30, 2 }
  0x66   : > { %s631_s19 = scalar_lea.vmem %s5267_s3, %s5412_s25  ;;  %p656_p2 = scmp.lt.s32.totalorder %s2514_s14, 3 }
  0x67   : > { %s2516_s12 = sshll.u32 %s5416_s17, 3  ;;  %p2518_p3 = scmp.le.s32.totalorder %s3328_s28, 0 }
  0x68   : > { %s3347_s29 = scalar_lea.vmem %s5274_s10, %s2516_s12  ;;  %s5418_s14 = smov (!%p656_p2, %s2514_s14), 3 }
  0x69   : > { %s658_s18 = scalar_lea.vmem %s5268_s4, %s5418_s14  ;;  %694 = sbr.rel (%p2518_p3) target bundleno = 1570 (0x622), region = 60 }
  0x6a   : > { %s3151_s27 = smov (!%p2518_p3), 127   ;;  %s3152_s12 = smov (!%p2518_p3), 126  }
  0x6b   : > { %s3153_s16 = smov (!%p2518_p3), 124   ;;  %s3154_s15 = smov (!%p2518_p3), 120  }
  0x6c   : > { %s3155_s13 = smov (!%p2518_p3), 112   ;;  %s3156_s20 = smov (!%p2518_p3), 96  }
  0x6d   : > { %s2543_s28 = sshll.u32 (!%p2518_p3), %s3136_s23, 6 }
  0x6e   : > { %v695_v0 = vld [vmem:[%s3317_s11] sm:$0xff]  ;;  %v696_v2 = vld [vmem:[%s3317_s11 + $0x8] sm:$0xff]  ;;  %v697_v5 = vld [vmem:[%s3317_s11 + $0x10] sm:$0xff]  ;;  %v3150_v7 = vmov 0   ;;  %vm726_vm0 = vcmask 130048   ;;  %vm1005_vm2 = vcmask 1040384  }
  0x6f   : > { %v699_v1 = vld [vmem:[%s3317_s11 + $0x20] sm:$0xff]  ;;  %v700_v4 = vld [vmem:[%s3317_s11 + $0x28] sm:$0xff]  ;;  %v701_v6 = vld [vmem:[%s3317_s11 + $0x30] sm:$0xff]  ;;  %2754 = vset.pattern.permute.xlu0 %v3150_v7  ;;  %2755 = vset.pattern.permute.xlu1 %v3150_v7  ;;  %vm1007_vm3 = vcmask 1042434   ;;  %vm1009_vm4 = vcmask 1041408  }
  0x70   : > { %v707_v3 = vpack.c.bf16 %v699_v1, %v695_v0  ;;  %v708_v8 = vpack.c.bf16 %v700_v4, %v696_v2  ;;  %v709_v9 = vpack.c.bf16 %v701_v6, %v697_v5  ;;  %v698_v10 = vld [vmem:[%s3317_s11 + $0x18] sm:$0xff]  ;;  %v2675_v12 = vld [vmem:[%s5270_s6] sm:$0xff]  ;;  %2756 = vset.pattern.permute.xlu2 %v3150_v7  ;;  %v706_v15 = vld [vmem:[%s5271_s7 + $0x8] sm:$0xff] }
  0x71   : > { %v702_v11 = vld [vmem:[%s3317_s11 + $0x38] sm:$0xff]  ;;  %v705_v14 = vld [vmem:[%s5271_s7] sm:$0xff]  ;;  %v800_v29 = vld [vmem:[%s5273_s9 + $0x10] sm:$0xff] }
  0x72   : > { %737 = vmatpush.bf16.msra.mxu0 %v707_v3  ;;  %v710_v13 = vpack.c.bf16 %v702_v11, %v698_v10  ;;  %751 = vmatpush.bf16.msra.mxu1 %v708_v8  ;;  %v801_v19 = vld [vmem:[%s5273_s9 + $0x18] sm:$0xff]  ;;  %v799_v30 = vld [vmem:[%s5273_s9 + $0x8] sm:$0xff]  ;;  %v2676_v38 = vld [vmem:[%s5272_s8] sm:$0xff] }
  0x73   : > { %765 = vmatpush.bf16.msra.mxu2 %v709_v9  ;;  %713 = vperm.xlu0 %2754, %v705_v14   ;;  %v798_v43 = vld [vmem:[%s5273_s9] sm:$0xff]  ;;  %v2677_v51 = vld [vmem:[%s5272_s8 + $0x8] sm:$0xff] }
  0x74   : > { %779 = vmatpush.bf16.msra.mxu3 %v710_v13  ;;  %823 = vperm.xlu1 %2755, %v801_v19   ;;  %v3407_v52 = vld [vmem:[%s3336_s1] sm:$0xf] }
  0x75   : > { %2523 = vmatmul.msk.bf16.vlgmr.msra.gmra.mxu0 %vm726_vm0, %v2675_v12  ;;  %2524 = vmatmul.msk.bf16.vlgmr.msra.gmra.mxu1 %vm726_vm0, %v2675_v12  ;;  %v3410_v53 = vperm.slane %v3407_v52, 0  ;;  %v3415_v54 = vperm.slane %v3407_v52, 1  ;;  %v3418_v55 = vperm.slane %v3407_v52, 3  ;;  %v3425_v58 = vperm.slane %v3407_v52, 2 }
  0x76   : > { %2525 = vmatmul.msk.bf16.vlgmr.msra.gmra.mxu2 %vm726_vm0, %v2675_v12  ;;  %813 = vperm.xlu2 %2756, %v799_v30  }
  0x77   : > { %2526 = vmatmul.msk.bf16.vlgmr.msra.gmra.mxu3 %vm726_vm0, %v2675_v12 }
  0x7b   : > { %718 = vperm.xlu0 %2754, %v706_v15  }
  0x7c   : > { %818 = vperm.xlu1 %2755, %v800_v29  }
  0x7e   : > { %808 = vperm.xlu2 %2756, %v798_v43  }
  0x83   : > { %939 = vrot.lane.b32.xlu0 %v3410_v53, %s3151_s27 }
  0x84   : > { %941 = vrot.lane.b32.xlu1 %v3415_v54, %s3151_s27 }
  0x86   : > { %943 = vrot.lane.b32.xlu2 %v3425_v58, %s3151_s27 }
  0x8b   : > { %945 = vrot.lane.b32.xlu0 %v3418_v55, %s3151_s27 }
  0xd0   : > { %v814_v8 = vpop.permute.xlu2 %813 }
  0xd8   : > { %v809_v30 = vpop.permute.xlu2 %808 }
  0xe5   : > { %v714_v16 = vpop.permute.xlu0 %713 }
  0xe6   : > { %v824_v59 = vpop.permute.xlu1 %823 }
  0xed   : > { %v719_v20 = vpop.permute.xlu0 %718 }
  0xee   : > { %v819_v0 = vpop.permute.xlu1 %818 }
  0xf2   : > { %v739_v17 = vpop.f32.mrf.mxu0  ;;  %v753_v18 = vpop.f32.mrf.mxu1 }
  0xf3   : > { %v740_v21 = vadd.f32 %v739_v17, %v714_v16  ;;  %v754_v23 = vadd.f32 %v753_v18, %v714_v16 }
  0xf5   : > { %v786_v31 = vmax.f32 %v740_v21, 0.0  ;;  %v787_v33 = vmax.f32 %v754_v23, 0.0 }
  0xf9   : > { %v767_v22 = vpop.f32.mrf.mxu2 }
  0xfa   : > { %v781_v24 = vpop.f32.mrf.mxu3  ;;  %v741_v25 = vpop.f32.mrf.mxu0  ;;  %v768_v36 = vadd.f32 %v767_v22, %v714_v16 }
  0xfb   : > { %v742_v26 = vadd.f32 %v741_v25, %v719_v20  ;;  %v755_v27 = vpop.f32.mrf.mxu1  ;;  %v782_v39 = vadd.f32 %v781_v24, %v714_v16 }
  0xfc   : > { %v756_v28 = vadd.f32 %v755_v27, %v719_v20  ;;  %v788_v45 = vmax.f32 %v768_v36, 0.0 }
  0xfd   : > { %v790_v32 = vmax.f32 %v742_v26, 0.0  ;;  %v789_v47 = vmax.f32 %v782_v39, 0.0 }
  0xfe   : > { %v791_v34 = vmax.f32 %v756_v28, 0.0 }
  0xff   : > { %v802_v35 = vpack.c.bf16 %v790_v32, %v786_v31 }
 0x100   : > { %v803_v37 = vpack.c.bf16 %v791_v34, %v787_v33 }
 0x101   : > { %v769_v40 = vpop.f32.mrf.mxu2  ;;  %849 = vmatpush.bf16.msrb.mxu0 %v802_v35 }
 0x102   : > { %v770_v41 = vadd.f32 %v769_v40, %v719_v20  ;;  %v783_v42 = vpop.f32.mrf.mxu3  ;;  %868 = vmatpush.bf16.msrb.mxu1 %v803_v37 }
 0x103   : > { %v784_v44 = vadd.f32 %v783_v42, %v719_v20 }
 0x104   : > { %v792_v46 = vmax.f32 %v770_v41, 0.0  ;;  %2535 = vmatmul.msk.bf16.vlgmr.msrb.gmra.mxu0 %vm726_vm0, %v2676_v38 }
 0x105   : > { %v793_v48 = vmax.f32 %v784_v44, 0.0  ;;  %2537 = vmatmul.msk.bf16.vlgmr.msrb.gmra.mxu1 %vm726_vm0, %v2676_v38 }
 0x106   : > { %v804_v49 = vpack.c.bf16 %v792_v46, %v788_v45 }
 0x107   : > { %v805_v50 = vpack.c.bf16 %v793_v48, %v789_v47 }
 0x108   : > { %887 = vmatpush.bf16.msrb.mxu2 %v804_v49 }
 0x109   : > { %906 = vmatpush.bf16.msrb.mxu3 %v805_v50 }
 0x10b   : > { %2539 = vmatmul.msk.bf16.vlgmr.msrb.gmra.mxu2 %vm726_vm0, %v2676_v38 }
 0x10c   : > { %2541 = vmatmul.msk.bf16.vlgmr.msrb.gmra.mxu3 %vm726_vm0, %v2676_v38 }
 0x114   : > { %2536 = vmatmul.msk.bf16.gmra.mxu0 %vm726_vm0, %v2677_v51 }
 0x115   : > { %2538 = vmatmul.msk.bf16.gmra.mxu1 %vm726_vm0, %v2677_v51 }
 0x11b   : > { %2540 = vmatmul.msk.bf16.gmra.mxu2 %vm726_vm0, %v2677_v51 }
 0x11c   : > { %2542 = vmatmul.msk.bf16.gmra.mxu3 %vm726_vm0, %v2677_v51 }
 0x181   : > { %v851_v56 = vpop.f32.mrf.mxu0 }
 0x182   : > { %v870_v57 = vpop.f32.mrf.mxu1  ;;  %v852_v32 = vadd.f32 %v851_v56, %v809_v30 }
 0x183   : > { %v871_v33 = vadd.f32 %v870_v57, %v809_v30 }
 0x184   : > { %v3463_v40 = vmax.f32 %v852_v32, 0.0 }
 0x185   : > { %v3465_v41 = vmax.f32 %v871_v33, 0.0 }
 0x187   : > { %v2787_v45 = vpack.i.bf16 %v3465_v41, %v3463_v40 }
 0x189   : > { %v853_v60 = vpop.f32.mrf.mxu0 }
 0x18a   : > { %v872_v61 = vpop.f32.mrf.mxu1  ;;  %v854_v42 = vadd.f32 %v853_v60, %v814_v8  ;;  %v947_v60 = vlaneseq }
 0x18b   : > { %v873_v43 = vadd.f32 %v872_v61, %v814_v8 }
 0x18c   : > { %v3472_v46 = vmax.f32 %v854_v42, 0.0  ;;  %v3494_v61 = vand.u32 127, %v947_v60 }
 0x18d   : > { %v3474_v47 = vmax.f32 %v873_v43, 0.0 }
 0x18e   : > { %v889_v62 = vpop.f32.mrf.mxu2  ;;  %vm949_vm1 = vcmp.lt.s32.totalorder %v3494_v61, 127  ;;  %vm1061_vm10 = vcmp.lt.s32.totalorder %v3494_v61, 126  ;;  %vm1170_vm0 = vcmp.lt.s32.totalorder %v3494_v61, 124 }
 0x18f   : > { %v908_v63 = vpop.f32.mrf.mxu3  ;;  %v890_v48 = vadd.f32 %v889_v62, %v809_v30  ;;  %v2777_v50 = vpack.i.bf16 %v3474_v47, %v3472_v46  ;;  %v942_v62 = vpop.permute.xlu1 %941 }
 0x190   : > { %v909_v49 = vadd.f32 %v908_v63, %v809_v30 }
 0x191   : > { %v856_v1 = vpop.f32.mrf.mxu0  ;;  %v3482_v51 = vmax.f32 %v890_v48, 0.0 }
 0x192   : > { %v857_v2 = vadd.f32 %v856_v1, %v819_v0  ;;  %v875_v3 = vpop.f32.mrf.mxu1  ;;  %v3484_v56 = vmax.f32 %v909_v49, 0.0 }
 0x193   : > { %v876_v4 = vadd.f32 %v875_v3, %v819_v0 }
 0x194   : > { %v3429_v5 = vmax.f32 %v857_v2, 0.0  ;;  %v2792_v57 = vpack.i.bf16 %v3484_v56, %v3482_v51 }
 0x195   : > { %v3431_v6 = vmax.f32 %v876_v4, 0.0 }
 0x196   : > { %v891_v9 = vpop.f32.mrf.mxu2 }
 0x197   : > { %v892_v10 = vadd.f32 %v891_v9, %v814_v8  ;;  %v910_v11 = vpop.f32.mrf.mxu3  ;;  %v2757_v12 = vpack.i.bf16 %v3431_v6, %v3429_v5 }
 0x198   : > { %v911_v13 = vadd.f32 %v910_v11, %v814_v8 }
 0x199   : > { %2758 = vrot.lane.b32.xlu0 %v2757_v12, %s3151_s27  ;;  %v858_v14 = vpop.f32.mrf.mxu0  ;;  %v3436_v17 = vmax.f32 %v892_v10, 0.0 }
 0x19a   : > { %v859_v15 = vadd.f32 %v858_v14, %v824_v59  ;;  %v877_v16 = vpop.f32.mrf.mxu1  ;;  %v3438_v18 = vmax.f32 %v911_v13, 0.0 }
 0x19b   : > { %v878_v19 = vadd.f32 %v877_v16, %v824_v59 }
 0x19c   : > { %v3440_v20 = vmax.f32 %v859_v15, 0.0  ;;  %v2782_v26 = vpack.i.bf16 %v3438_v18, %v3436_v17 }
 0x19d   : > { %v3442_v21 = vmax.f32 %v878_v19, 0.0 }
 0x19e   : > { %v894_v22 = vpop.f32.mrf.mxu2 }
 0x19f   : > { %v895_v23 = vadd.f32 %v894_v22, %v819_v0  ;;  %v913_v24 = vpop.f32.mrf.mxu3  ;;  %v2762_v25 = vpack.i.bf16 %v3442_v21, %v3440_v20 }
 0x1a0   : > { %v914_v27 = vadd.f32 %v913_v24, %v819_v0  ;;  %v944_v0 = vpop.permute.xlu2 %943 }
 0x1a1   : > { %2763 = vrot.lane.b32.xlu1 %v2762_v25, %s3151_s27  ;;  %2783 = vrot.lane.b32.xlu0 %v2782_v26, %s3151_s27  ;;  %v3450_v28 = vmax.f32 %v895_v23, 0.0  ;;  %v951_v1 = vsel %vm949_vm1, %v942_v62, %v944_v0 }
 0x1a2   : > { %v3452_v29 = vmax.f32 %v914_v27, 0.0  ;;  %v1002_v4 = vrot.slane %v951_v1, 7 }
 0x1a4   : > { %v2767_v36 = vpack.i.bf16 %v3452_v29, %v3450_v28 }
 0x1a6   : > { %v896_v31 = vpop.f32.mrf.mxu2 }
 0x1a7   : > { %v897_v34 = vadd.f32 %v896_v31, %v824_v59  ;;  %v915_v35 = vpop.f32.mrf.mxu3 }
 0x1a8   : > { %v916_v37 = vadd.f32 %v915_v35, %v824_v59  ;;  %v940_v59 = vpop.permute.xlu0 %939 }
 0x1a9   : > { %v3456_v38 = vmax.f32 %v897_v34, 0.0  ;;  %2768 = vrot.lane.b32.xlu1 %v2767_v36, %s3151_s27  ;;  %1053 = vrot.lane.b32.xlu0 %v3410_v53, %s3152_s12  ;;  %v952_v10 = vsel %vm949_vm1, %v940_v59, %v942_v62 }
 0x1aa   : > { %v3461_v39 = vmax.f32 %v916_v37, 0.0  ;;  %v1006_v11 = vsel %vm1005_vm2, %v952_v10, %v1002_v4 }
 0x1ac   : > { %v2772_v44 = vpack.i.bf16 %v3461_v39, %v3456_v38 }
 0x1ae   : > { %2773 = vrot.lane.b32.xlu2 %v2772_v44, %s3151_s27 }
 0x1b0   : > { %v946_v63 = vpop.permute.xlu0 %945 }
 0x1b1   : > { %2788 = vrot.lane.b32.xlu1 %v2787_v45, %s3151_s27  ;;  %1059 = vrot.lane.b32.xlu0 %v3418_v55, %s3152_s12  ;;  %v950_v2 = vsel %vm949_vm1, %v944_v0, %v946_v63  ;;  %v953_v3 = vsel %vm949_vm1, %v946_v63, %v940_v59 }
 0x1b2   : > { %v1003_v8 = vrot.slane %v950_v2, 6  ;;  %v1004_v9 = vrot.slane %v953_v3, 5 }
 0x1b4   : > { %v1008_v12 = vsel %vm1007_vm3, %v1003_v8, %v1004_v9 }
 0x1b5   : > { %v1010_v13 = vsel %vm1009_vm4, %v1006_v11, %v1008_v12 }
 0x1b6   : > { %2778 = vrot.lane.b32.xlu2 %v2777_v50, %s3151_s27  ;;  %vm1011_vm5 = vcmp.eq.s32.totalorder %v3407_v52, %v1010_v13 }
 0x1b7   : > { %v1028_v16 = vsel %vm1011_vm5, 1, %v3150_v7 }
 0x1b8   : > { %v1031_v23 = vperm.slane %v1028_v16, 2  ;;  %v1032_v30 = vperm.slane %v1028_v16, 3  ;;  %v1029_v32 = vperm.slane %v1028_v16, 0  ;;  %v1030_v36 = vperm.slane %v1028_v16, 1 }
 0x1b9   : > { %1055 = vrot.lane.b32.xlu1 %v3415_v54, %s3152_s12 }
 0x1ba   : > { %vm3512_vm6 = vcmp.eq.s32.totalorder %v1031_v23, 1  ;;  %vm3528_vm7 = vcmp.eq.s32.totalorder %v1032_v30, 1  ;;  %vm3532_vm8 = vcmp.eq.s32.totalorder %v1029_v32, 1  ;;  %vm3536_vm9 = vcmp.eq.s32.totalorder %v1030_v36, 1 }
 0x1be   : > { %2793 = vrot.lane.b32.xlu2 %v2792_v57, %s3151_s27 }
 0x1c6   : > { %1057 = vrot.lane.b32.xlu2 %v3425_v58, %s3152_s12 }
 0x208   : > { %v2774_v14 = vpop.permute.xlu2 %2773 }
 0x209   : > { %v2776_v19 = vunpack.i.h.bf16 %v2774_v14  ;;  %v2775_v22 = vunpack.i.l.bf16 %v2774_v14 }
 0x20b   : > { %v2759_v15 = vpop.permute.xlu0 %2758  ;;  %v989_v25 = vsel %vm949_vm1, %v2775_v22, %v2776_v19 }
 0x20c   : > { %v1026_v33 = vmax.f32 %v3456_v38, %v989_v25  ;;  %v2761_v37 = vunpack.i.h.bf16 %v2759_v15  ;;  %v2760_v42 = vunpack.i.l.bf16 %v2759_v15 }
 0x20e   : > { %v996_v3 = vsel %vm949_vm1, %v2760_v42, %v2761_v37  ;;  %v3545_v8 = vsel %vm3512_vm6, %v1026_v33, %v3456_v38 }
 0x20f   : > { %v1020_v16 = vmax.f32 %v3429_v5, %v996_v3 }
 0x210   : > { %v2779_v24 = vpop.permute.xlu2 %2778 }
 0x211   : > { %v2781_v43 = vunpack.i.h.bf16 %v2779_v24  ;;  %v2780_v45 = vunpack.i.l.bf16 %v2779_v24 }
 0x213   : > { %v2764_v26 = vpop.permute.xlu1 %2763  ;;  %v2784_v27 = vpop.permute.xlu0 %2783  ;;  %v995_v10 = vsel %vm949_vm1, %v2780_v45, %v2781_v43 }
 0x214   : > { %v2766_v34 = vunpack.i.h.bf16 %v2764_v26  ;;  %v2765_v35 = vunpack.i.l.bf16 %v2764_v26  ;;  %v2785_v44 = vunpack.i.l.bf16 %v2784_v27  ;;  %v2786_v4 = vunpack.i.h.bf16 %v2784_v27 }
 0x216   : > { %v993_v48 = vsel %vm949_vm1, %v2766_v34, %v2775_v22  ;;  %v997_v49 = vsel %vm949_vm1, %v2765_v35, %v2766_v34  ;;  %v1001_v50 = vsel %vm949_vm1, %v2776_v19, %v2765_v35  ;;  %v991_v63 = vsel %vm949_vm1, %v2781_v43, %v2785_v44 }
 0x217   : > { %v1025_v57 = vmax.f32 %v3442_v21, %v993_v48  ;;  %v1024_v59 = vmax.f32 %v3440_v20, %v997_v49  ;;  %v1027_v62 = vmax.f32 %v3461_v39, %v1001_v50  ;;  %v987_v23 = vsel %vm949_vm1, %v2785_v44, %v2786_v4 }
 0x218   : > { %v2794_v11 = vpop.permute.xlu2 %2793  ;;  %v999_v35 = vsel %vm949_vm1, %v2786_v4, %v2780_v45  ;;  %v1018_v36 = vmax.f32 %v3436_v17, %v987_v23 }
 0x219   : > { %v3550_v9 = vsel %vm3528_vm7, %v1027_v62, %v3461_v39  ;;  %v3559_v13 = vsel %vm3532_vm8, %v1024_v59, %v3440_v20  ;;  %v3564_v38 = vsel %vm3536_vm9, %v1025_v57, %v3442_v21  ;;  %v1017_v39 = vmax.f32 %v3474_v47, %v991_v63 }
 0x21a   : > { %v2812_v12 = vpack.i.bf16 %v3550_v9, %v3545_v8  ;;  %v2802_v15 = vpack.i.bf16 %v3564_v38, %v3559_v13  ;;  %v1016_v20 = vmax.f32 %v3472_v46, %v995_v10  ;;  %v2796_v24 = vunpack.i.h.bf16 %v2794_v11 }
 0x21b   : > { %v2769_v14 = vpop.permute.xlu1 %2768  ;;  %v2795_v21 = vunpack.i.l.bf16 %v2794_v11  ;;  %v3587_v34 = vsel %vm3536_vm9, %v1017_v39, %v3474_v47  ;;  %v3639_v63 = vsel %vm3512_vm6, %v1018_v36, %v3436_v17 }
 0x21c   : > { %v2771_v19 = vunpack.i.h.bf16 %v2769_v14  ;;  %v2770_v22 = vunpack.i.l.bf16 %v2769_v14  ;;  %2813 = vrot.lane.b32.xlu2 %v2812_v12, %s3152_s12  ;;  %2803 = vrot.lane.b32.xlu1 %v2802_v15, %s3152_s12  ;;  %v3605_v47 = vsel %vm3532_vm8, %v1016_v20, %v3472_v46 }
 0x21d   : > { %v986_v44 = vsel %vm949_vm1, %v2795_v21, %v2796_v24  ;;  %v2817_v46 = vpack.i.bf16 %v3587_v34, %v3605_v47 }
 0x21e   : > { %v988_v25 = vsel %vm949_vm1, %v2770_v22, %v2771_v19  ;;  %v992_v26 = vsel %vm949_vm1, %v2761_v37, %v2770_v22  ;;  %v1000_v27 = vsel %vm949_vm1, %v2771_v19, %v2760_v42  ;;  %v3595_v37 = vsel %vm3532_vm8, %v1020_v16, %v3429_v5 }
 0x21f   : > { %v1021_v30 = vmax.f32 %v3431_v6, %v992_v26  ;;  %v1022_v32 = vmax.f32 %v3450_v28, %v988_v25  ;;  %v1023_v33 = vmax.f32 %v3452_v29, %v1000_v27 }
 0x220   : > { %v1058_v1 = vpop.permute.xlu2 %1057 }
 0x221   : > { %v3600_v42 = vsel %vm3536_vm9, %v1021_v30, %v3431_v6  ;;  %v3610_v43 = vsel %vm3512_vm6, %v1022_v32, %v3450_v28  ;;  %v3615_v5 = vsel %vm3528_vm7, %v1023_v33, %v3452_v29  ;;  %v1019_v28 = vmax.f32 %v3438_v18, %v999_v35 }
 0x222   : > { %v2797_v6 = vpack.i.bf16 %v3600_v42, %v3595_v37  ;;  %v2807_v45 = vpack.i.bf16 %v3615_v5, %v3610_v43  ;;  %v1014_v29 = vmax.f32 %v3482_v51, %v986_v44 }
 0x223   : > { %v2789_v48 = vpop.permute.xlu1 %2788  ;;  %v3647_v11 = vsel %vm3528_vm7, %v1019_v28, %v3438_v18 }
 0x224   : > { %v2791_v49 = vunpack.i.h.bf16 %v2789_v48  ;;  %v2790_v50 = vunpack.i.l.bf16 %v2789_v48  ;;  %2798 = vrot.lane.b32.xlu0 %v2797_v6, %s3152_s12  ;;  %2818 = vrot.lane.b32.xlu2 %v2817_v46, %s3152_s12  ;;  %v3652_v12 = vsel %vm3512_vm6, %v1014_v29, %v3482_v51  ;;  %v2822_v31 = vpack.i.bf16 %v3647_v11, %v3639_v63 }
 0x225   : > { %2808 = vrot.lane.b32.xlu1 %v2807_v45, %s3152_s12 }
 0x226   : > { %v990_v57 = vsel %vm949_vm1, %v2791_v49, %v2795_v21  ;;  %v994_v59 = vsel %vm949_vm1, %v2790_v50, %v2791_v49  ;;  %v998_v62 = vsel %vm949_vm1, %v2796_v24, %v2790_v50 }
 0x227   : > { %v1013_v3 = vmax.f32 %v3465_v41, %v990_v57  ;;  %v1012_v4 = vmax.f32 %v3463_v40, %v994_v59  ;;  %v1015_v10 = vmax.f32 %v3484_v56, %v998_v62 }
 0x229   : > { %v3657_v17 = vsel %vm3528_vm7, %v1015_v10, %v3484_v56  ;;  %v3662_v39 = vsel %vm3532_vm8, %v1012_v4, %v3463_v40  ;;  %v3667_v18 = vsel %vm3536_vm9, %v1013_v3, %v3465_v41  ;;  %v1054_v40 = vpop.permute.xlu0 %1053  ;;  %vm1279_vm9 = vcmp.lt.s32.totalorder %v3494_v61, 120 }
 0x22a   : > { %v2832_v51 = vpack.i.bf16 %v3657_v17, %v3652_v12  ;;  %v2827_v56 = vpack.i.bf16 %v3667_v18, %v3662_v39 }
 0x22b   : > { %v1056_v0 = vpop.permute.xlu1 %1055 }
 0x22c   : > { %2823 = vrot.lane.b32.xlu0 %v2822_v31, %s3152_s12  ;;  %2833 = vrot.lane.b32.xlu2 %v2832_v51, %s3152_s12  ;;  %v1063_v15 = vsel %vm1061_vm10, %v1056_v0, %v1058_v1  ;;  %v1064_v20 = vsel %vm1061_vm10, %v1054_v40, %v1056_v0 }
 0x22d   : > { %2828 = vrot.lane.b32.xlu1 %v2827_v56, %s3152_s12  ;;  %v1114_v22 = vrot.slane %v1063_v15, 7 }
 0x22f   : > { %v1117_v24 = vsel %vm1005_vm2, %v1064_v20, %v1114_v22 }
 0x231   : > { %v1060_v41 = vpop.permute.xlu0 %1059 }
 0x232   : > { %v1062_v2 = vsel %vm1061_vm10, %v1058_v1, %v1060_v41  ;;  %v1065_v14 = vsel %vm1061_vm10, %v1060_v41, %v1054_v40 }
 0x233   : > { %v1115_v16 = vrot.slane %v1062_v2, 6  ;;  %v1116_v19 = vrot.slane %v1065_v14, 5 }
 0x234   : > { %1162 = vrot.lane.b32.xlu0 %v3410_v53, %s3153_s16  ;;  %1166 = vrot.lane.b32.xlu2 %v3425_v58, %s3153_s16 }
 0x235   : > { %1164 = vrot.lane.b32.xlu1 %v3415_v54, %s3153_s16  ;;  %v1118_v23 = vsel %vm1007_vm3, %v1115_v16, %v1116_v19 }
 0x236   : > { %v1119_v21 = vsel %vm1009_vm4, %v1117_v24, %v1118_v23 }
 0x237   : > { %vm1120_vm11 = vcmp.eq.s32.totalorder %v3407_v52, %v1119_v21 }
 0x238   : > { %v1137_v30 = vsel %vm1120_vm11, 1, %v3150_v7 }
 0x239   : > { %v1140_v33 = vperm.slane %v1137_v30, 2  ;;  %v1138_v36 = vperm.slane %v1137_v30, 0  ;;  %v1141_v46 = vperm.slane %v1137_v30, 3  ;;  %v1139_v45 = vperm.slane %v1137_v30, 1 }
 0x23b   : > { %vm3709_vm12 = vcmp.eq.s32.totalorder %v1140_v33, 1  ;;  %vm3716_vm13 = vcmp.eq.s32.totalorder %v1141_v46, 1  ;;  %vm3720_vm14 = vcmp.eq.s32.totalorder %v1138_v36, 1  ;;  %vm3724_vm15 = vcmp.eq.s32.totalorder %v1139_v45, 1 }
 0x23c   : > { %1168 = vrot.lane.b32.xlu0 %v3418_v55, %s3153_s16 }
 0x276   : > { %v2814_v25 = vpop.permute.xlu2 %2813 }
 0x277   : > { %v2816_v26 = vunpack.i.h.bf16 %v2814_v25  ;;  %v2815_v27 = vunpack.i.l.bf16 %v2814_v25 }
 0x279   : > { %v1101_v32 = vsel %vm1061_vm10, %v2815_v27, %v2816_v26 }
 0x27a   : > { %v1135_v28 = vmax.f32 %v3545_v8, %v1101_v32 }
 0x27c   : > { %v3731_v51 = vsel %vm3709_vm12, %v1135_v28, %v3545_v8 }
 0x27e   : > { %v2819_v57 = vpop.permute.xlu2 %2818 }
 0x27f   : > { %v2820_v19 = vunpack.i.l.bf16 %v2819_v57 }
 0x286   : > { %v2834_v32 = vpop.permute.xlu2 %2833 }
 0x28e   : > { %v2804_v35 = vpop.permute.xlu1 %2803  ;;  %v1167_v4 = vpop.permute.xlu2 %1166 }
 0x28f   : > { %v2806_v44 = vunpack.i.h.bf16 %v2804_v35  ;;  %v2805_v6 = vunpack.i.l.bf16 %v2804_v35 }
 0x291   : > { %v1105_v48 = vsel %vm1061_vm10, %v2806_v44, %v2815_v27  ;;  %v1109_v49 = vsel %vm1061_vm10, %v2805_v6, %v2806_v44  ;;  %v1113_v50 = vsel %vm1061_vm10, %v2816_v26, %v2805_v6 }
 0x292   : > { %v1134_v59 = vmax.f32 %v3564_v38, %v1105_v48  ;;  %v1133_v62 = vmax.f32 %v3559_v13, %v1109_v49  ;;  %v1136_v3 = vmax.f32 %v3550_v9, %v1113_v50  ;;  %v2835_v48 = vunpack.i.l.bf16 %v2834_v32 }
 0x294   : > { %v3736_v56 = vsel %vm3716_vm13, %v1136_v3, %v3550_v9  ;;  %v3741_v40 = vsel %vm3720_vm14, %v1133_v62, %v3559_v13  ;;  %v3746_v41 = vsel %vm3724_vm15, %v1134_v59, %v3564_v38  ;;  %v2821_v13 = vunpack.i.h.bf16 %v2819_v57 }
 0x295   : > { %v2852_v8 = vpack.i.bf16 %v3736_v56, %v3731_v51  ;;  %v2842_v1 = vpack.i.bf16 %v3746_v41, %v3741_v40 }
 0x296   : > { %v2799_v0 = vpop.permute.xlu0 %2798  ;;  %v1107_v30 = vsel %vm1061_vm10, %v2820_v19, %v2821_v13 }
 0x297   : > { %v2801_v2 = vunpack.i.h.bf16 %v2799_v0  ;;  %v2800_v9 = vunpack.i.l.bf16 %v2799_v0  ;;  %v2809_v14 = vpop.permute.xlu1 %2808  ;;  %2853 = vrot.lane.b32.xlu2 %v2852_v8, %s3153_s16  ;;  %2843 = vrot.lane.b32.xlu1 %v2842_v1, %s3153_s16  ;;  %v1125_v28 = vmax.f32 %v3605_v47, %v1107_v30 }
 0x298   : > { %v2811_v15 = vunpack.i.h.bf16 %v2809_v14  ;;  %v2810_v16 = vunpack.i.l.bf16 %v2809_v14 }
 0x299   : > { %v1108_v38 = vsel %vm1061_vm10, %v2800_v9, %v2801_v2 }
 0x29a   : > { %v1129_v22 = vmax.f32 %v3595_v37, %v1108_v38  ;;  %v1112_v20 = vsel %vm1061_vm10, %v2811_v15, %v2800_v9  ;;  %v1100_v23 = vsel %vm1061_vm10, %v2810_v16, %v2811_v15  ;;  %v1104_v24 = vsel %vm1061_vm10, %v2801_v2, %v2810_v16 }
 0x29b   : > { %v1132_v21 = vmax.f32 %v3615_v5, %v1112_v20  ;;  %v1130_v25 = vmax.f32 %v3600_v42, %v1104_v24  ;;  %v1131_v26 = vmax.f32 %v3610_v43, %v1100_v23 }
 0x29c   : > { %v3769_v27 = vsel %vm3720_vm14, %v1129_v22, %v3595_v37 }
 0x29d   : > { %v3776_v33 = vsel %vm3724_vm15, %v1130_v25, %v3600_v42  ;;  %v3781_v35 = vsel %vm3709_vm12, %v1131_v26, %v3610_v43  ;;  %v3786_v36 = vsel %vm3716_vm13, %v1132_v21, %v3615_v5  ;;  %v2836_v5 = vunpack.i.h.bf16 %v2834_v32 }
 0x29e   : > { %v2824_v37 = vpop.permute.xlu0 %2823  ;;  %v2837_v44 = vpack.i.bf16 %v3776_v33, %v3769_v27  ;;  %v2847_v6 = vpack.i.bf16 %v3786_v36, %v3781_v35 }
 0x29f   : > { %v2826_v46 = vunpack.i.h.bf16 %v2824_v37  ;;  %v2825_v42 = vunpack.i.l.bf16 %v2824_v37  ;;  %v2829_v45 = vpop.permute.xlu1 %2828 }
 0x2a0   : > { %v2831_v43 = vunpack.i.h.bf16 %v2829_v45  ;;  %v2830_v49 = vunpack.i.l.bf16 %v2829_v45  ;;  %2838 = vrot.lane.b32.xlu0 %v2837_v44, %s3153_s16  ;;  %2848 = vrot.lane.b32.xlu1 %v2847_v6, %s3153_s16 }
 0x2a1   : > { %v1099_v50 = vsel %vm1061_vm10, %v2825_v42, %v2826_v46  ;;  %v1103_v57 = vsel %vm1061_vm10, %v2821_v13, %v2825_v42  ;;  %v1111_v59 = vsel %vm1061_vm10, %v2826_v46, %v2820_v19  ;;  %v3827_v19 = vsel %vm3720_vm14, %v1125_v28, %v3605_v47 }
 0x2a2   : > { %v1126_v62 = vmax.f32 %v3587_v34, %v1103_v57  ;;  %v1127_v3 = vmax.f32 %v3639_v63, %v1099_v50  ;;  %v1128_v0 = vmax.f32 %v3647_v11, %v1111_v59  ;;  %v1102_v8 = vsel %vm1061_vm10, %v2831_v43, %v2835_v48 }
 0x2a3   : > { %v1122_v1 = vmax.f32 %v3667_v18, %v1102_v8  ;;  %v1106_v2 = vsel %vm1061_vm10, %v2830_v49, %v2831_v43  ;;  %v1110_v9 = vsel %vm1061_vm10, %v2836_v5, %v2830_v49 }
 0x2a4   : > { %v1121_v14 = vmax.f32 %v3662_v39, %v1106_v2  ;;  %v3815_v15 = vsel %vm3709_vm12, %v1127_v3, %v3639_v63  ;;  %v3820_v16 = vsel %vm3716_vm13, %v1128_v0, %v3647_v11  ;;  %v3832_v38 = vsel %vm3724_vm15, %v1126_v62, %v3587_v34 }
 0x2a5   : > { %v2862_v13 = vpack.i.bf16 %v3820_v16, %v3815_v15  ;;  %v3837_v63 = vsel %vm3724_vm15, %v1122_v1, %v3667_v18  ;;  %v1098_v11 = vsel %vm1061_vm10, %v2835_v48, %v2836_v5  ;;  %v2857_v22 = vpack.i.bf16 %v3832_v38, %v3827_v19 }
 0x2a6   : > { %v3846_v47 = vsel %vm3720_vm14, %v1121_v14, %v3662_v39  ;;  %v1124_v20 = vmax.f32 %v3657_v17, %v1110_v9  ;;  %v1123_v18 = vmax.f32 %v3652_v12, %v1098_v11  ;;  %vm1388_vm15 = vcmp.lt.s32.totalorder %v3494_v61, 112 }
 0x2a7   : > { %v2867_v34 = vpack.i.bf16 %v3837_v63, %v3846_v47  ;;  %2858 = vrot.lane.b32.xlu2 %v2857_v22, %s3153_s16  ;;  %v1165_v29 = vpop.permute.xlu1 %1164 }
 0x2a8   : > { %2863 = vrot.lane.b32.xlu0 %v2862_v13, %s3153_s16  ;;  %v3858_v31 = vsel %vm3716_vm13, %v1124_v20, %v3657_v17  ;;  %v3863_v39 = vsel %vm3709_vm12, %v1123_v18, %v3652_v12  ;;  %v1163_v12 = vpop.permute.xlu0 %1162  ;;  %v1172_v21 = vsel %vm1170_vm0, %v1165_v29, %v1167_v4 }
 0x2a9   : > { %2868 = vrot.lane.b32.xlu1 %v2867_v34, %s3153_s16  ;;  %v2872_v10 = vpack.i.bf16 %v3858_v31, %v3863_v39  ;;  %v1223_v30 = vrot.slane %v1172_v21, 7  ;;  %v1173_v32 = vsel %vm1170_vm0, %v1163_v12, %v1165_v29 }
 0x2ab   : > { %v1226_v44 = vsel %vm1005_vm2, %v1173_v32, %v1223_v30 }
 0x2af   : > { %2873 = vrot.lane.b32.xlu2 %v2872_v10, %s3153_s16 }
 0x2b0   : > { %1271 = vrot.lane.b32.xlu0 %v3410_v53, %s3154_s15  ;;  %v1169_v17 = vpop.permute.xlu0 %1168 }
 0x2b1   : > { %1273 = vrot.lane.b32.xlu1 %v3415_v54, %s3154_s15  ;;  %v1171_v23 = vsel %vm1170_vm0, %v1167_v4, %v1169_v17  ;;  %v1174_v24 = vsel %vm1170_vm0, %v1169_v17, %v1163_v12 }
 0x2b2   : > { %v1224_v25 = vrot.slane %v1171_v23, 6  ;;  %v1225_v26 = vrot.slane %v1174_v24, 5 }
 0x2b4   : > { %v1227_v37 = vsel %vm1007_vm3, %v1224_v25, %v1225_v26 }
 0x2b5   : > { %v1228_v6 = vsel %vm1009_vm4, %v1226_v44, %v1227_v37 }
 0x2b6   : > { %vm1229_vm1 = vcmp.eq.s32.totalorder %v3407_v52, %v1228_v6 }
 0x2b7   : > { %1275 = vrot.lane.b32.xlu2 %v3425_v58, %s3154_s15  ;;  %v1246_v28 = vsel %vm1229_vm1, 1, %v3150_v7 }
 0x2b8   : > { %1277 = vrot.lane.b32.xlu0 %v3418_v55, %s3154_s15  ;;  %v1249_v43 = vperm.slane %v1246_v28, 2  ;;  %v1250_v5 = vperm.slane %v1246_v28, 3  ;;  %v1247_v59 = vperm.slane %v1246_v28, 0  ;;  %v1248_v62 = vperm.slane %v1246_v28, 1 }
 0x2ba   : > { %vm3899_vm5 = vcmp.eq.s32.totalorder %v1249_v43, 1  ;;  %vm3906_vm6 = vcmp.eq.s32.totalorder %v1250_v5, 1  ;;  %vm3910_vm7 = vcmp.eq.s32.totalorder %v1247_v59, 1  ;;  %vm3914_vm8 = vcmp.eq.s32.totalorder %v1248_v62, 1 }
 0x2f1   : > { %v2854_v46 = vpop.permute.xlu2 %2853 }
 0x2f2   : > { %v2856_v42 = vunpack.i.h.bf16 %v2854_v46  ;;  %v2855_v45 = vunpack.i.l.bf16 %v2854_v46 }
 0x2f4   : > { %v1210_v48 = vsel %vm1170_vm0, %v2855_v45, %v2856_v42 }
 0x2f5   : > { %v1244_v3 = vmax.f32 %v3731_v51, %v1210_v48 }
 0x2f7   : > { %v3921_v18 = vsel %vm3899_vm5, %v1244_v3, %v3731_v51 }
 0x301   : > { %v2859_v11 = vpop.permute.xlu2 %2858 }
 0x302   : > { %v2860_v26 = vunpack.i.l.bf16 %v2859_v11 }
 0x309   : > { %v2844_v49 = vpop.permute.xlu1 %2843 }
 0x30a   : > { %v2846_v50 = vunpack.i.h.bf16 %v2844_v49  ;;  %v2845_v57 = vunpack.i.l.bf16 %v2844_v49 }
 0x30c   : > { %v1214_v0 = vsel %vm1170_vm0, %v2846_v50, %v2855_v45  ;;  %v1218_v8 = vsel %vm1170_vm0, %v2845_v57, %v2846_v50  ;;  %v1222_v1 = vsel %vm1170_vm0, %v2856_v42, %v2845_v57 }
 0x30d   : > { %v1243_v9 = vmax.f32 %v3746_v41, %v1214_v0  ;;  %v1242_v14 = vmax.f32 %v3741_v40, %v1218_v8  ;;  %v1245_v13 = vmax.f32 %v3736_v56, %v1222_v1 }
 0x30f   : > { %v3926_v10 = vsel %vm3906_vm6, %v1245_v13, %v3736_v56  ;;  %v3931_v12 = vsel %vm3910_vm7, %v1242_v14, %v3741_v40  ;;  %v3936_v17 = vsel %vm3914_vm8, %v1243_v9, %v3746_v41  ;;  %v2861_v40 = vunpack.i.h.bf16 %v2859_v11 }
 0x310   : > { %v2892_v29 = vpack.i.bf16 %v3926_v10, %v3921_v18  ;;  %v2882_v51 = vpack.i.bf16 %v3936_v17, %v3931_v12 }
 0x311   : > { %v1216_v49 = vsel %vm1170_vm0, %v2860_v26, %v2861_v40 }
 0x312   : > { %v2839_v4 = vpop.permute.xlu0 %2838  ;;  %v2849_v23 = vpop.permute.xlu1 %2848  ;;  %2893 = vrot.lane.b32.xlu2 %v2892_v29, %s3154_s15  ;;  %2883 = vrot.lane.b32.xlu1 %v2882_v51, %s3154_s15 }
 0x313   : > { %v2841_v56 = vunpack.i.h.bf16 %v2839_v4  ;;  %v2840_v24 = vunpack.i.l.bf16 %v2839_v4  ;;  %v2851_v21 = vunpack.i.h.bf16 %v2849_v23  ;;  %v2850_v25 = vunpack.i.l.bf16 %v2849_v23 }
 0x315   : > { %v1217_v41 = vsel %vm1170_vm0, %v2840_v24, %v2841_v56  ;;  %v1221_v30 = vsel %vm1170_vm0, %v2851_v21, %v2840_v24  ;;  %v1209_v32 = vsel %vm1170_vm0, %v2850_v25, %v2851_v21  ;;  %v1213_v37 = vsel %vm1170_vm0, %v2841_v56, %v2850_v25 }
 0x316   : > { %v1238_v44 = vmax.f32 %v3769_v27, %v1217_v41  ;;  %v1241_v6 = vmax.f32 %v3786_v36, %v1221_v30  ;;  %v1239_v46 = vmax.f32 %v3776_v33, %v1213_v37  ;;  %v1240_v42 = vmax.f32 %v3781_v35, %v1209_v32 }
 0x318   : > { %v3959_v45 = vsel %vm3910_vm7, %v1238_v44, %v3769_v27  ;;  %v3964_v28 = vsel %vm3914_vm8, %v1239_v46, %v3776_v33  ;;  %v3969_v48 = vsel %vm3899_vm5, %v1240_v42, %v3781_v35  ;;  %v3974_v43 = vsel %vm3906_vm6, %v1241_v6, %v3786_v36  ;;  %v2874_v27 = vpop.permute.xlu2 %2873 }
 0x319   : > { %v2877_v5 = vpack.i.bf16 %v3964_v28, %v3959_v45  ;;  %v2887_v33 = vpack.i.bf16 %v3974_v43, %v3969_v48  ;;  %v1234_v36 = vmax.f32 %v3827_v19, %v1216_v49  ;;  %v2875_v62 = vunpack.i.l.bf16 %v2874_v27 }
 0x31a   : > { %v2864_v50 = vpop.permute.xlu0 %2863  ;;  %v2876_v8 = vunpack.i.h.bf16 %v2874_v27 }
 0x31b   : > { %v2866_v57 = vunpack.i.h.bf16 %v2864_v50  ;;  %v2865_v59 = vunpack.i.l.bf16 %v2864_v50  ;;  %v2869_v35 = vpop.permute.xlu1 %2868  ;;  %2878 = vrot.lane.b32.xlu0 %v2877_v5, %s3154_s15  ;;  %2888 = vrot.lane.b32.xlu1 %v2887_v33, %s3154_s15 }
 0x31c   : > { %v2871_v3 = vunpack.i.h.bf16 %v2869_v35  ;;  %v2870_v0 = vunpack.i.l.bf16 %v2869_v35 }
 0x31d   : > { %v1208_v1 = vsel %vm1170_vm0, %v2865_v59, %v2866_v57  ;;  %v1212_v9 = vsel %vm1170_vm0, %v2861_v40, %v2865_v59  ;;  %v1220_v14 = vsel %vm1170_vm0, %v2866_v57, %v2860_v26  ;;  %v4017_v26 = vsel %vm3910_vm7, %v1234_v36, %v3827_v19 }
 0x31e   : > { %v1235_v13 = vmax.f32 %v3832_v38, %v1212_v9  ;;  %v1236_v11 = vmax.f32 %v3815_v15, %v1208_v1  ;;  %v1237_v29 = vmax.f32 %v3820_v16, %v1220_v14  ;;  %v1211_v51 = vsel %vm1170_vm0, %v2871_v3, %v2875_v62 }
 0x31f   : > { %v1231_v4 = vmax.f32 %v3837_v63, %v1211_v51  ;;  %v1215_v23 = vsel %vm1170_vm0, %v2870_v0, %v2871_v3  ;;  %v1219_v56 = vsel %vm1170_vm0, %v2876_v8, %v2870_v0 }
 0x320   : > { %v1230_v24 = vmax.f32 %v3846_v47, %v1215_v23  ;;  %v4005_v21 = vsel %vm3899_vm5, %v1236_v11, %v3815_v15  ;;  %v4010_v25 = vsel %vm3906_vm6, %v1237_v29, %v3820_v16  ;;  %v4022_v41 = vsel %vm3914_vm8, %v1235_v13, %v3832_v38  ;;  %v1276_v22 = vpop.permute.xlu2 %1275 }
 0x321   : > { %v2902_v40 = vpack.i.bf16 %v4010_v25, %v4005_v21  ;;  %v4027_v15 = vsel %vm3914_vm8, %v1231_v4, %v3837_v63  ;;  %v1207_v16 = vsel %vm1170_vm0, %v2875_v62, %v2876_v8  ;;  %v2897_v30 = vpack.i.bf16 %v4022_v41, %v4017_v26 }
 0x322   : > { %v4036_v19 = vsel %vm3910_vm7, %v1230_v24, %v3846_v47  ;;  %v1233_v32 = vmax.f32 %v3858_v31, %v1219_v56  ;;  %v1232_v63 = vmax.f32 %v3863_v39, %v1207_v16  ;;  %vm1497_vm8 = vcmp.lt.s32.totalorder %v3494_v61, 96 }
 0x323   : > { %2903 = vrot.lane.b32.xlu0 %v2902_v40, %s3154_s15  ;;  %v2907_v38 = vpack.i.bf16 %v4027_v15, %v4036_v19  ;;  %2898 = vrot.lane.b32.xlu2 %v2897_v30, %s3154_s15  ;;  %v1274_v2 = vpop.permute.xlu1 %1273 }
 0x324   : > { %v4048_v34 = vsel %vm3906_vm6, %v1233_v32, %v3858_v31  ;;  %v4053_v47 = vsel %vm3899_vm5, %v1232_v63, %v3863_v39  ;;  %v1272_v31 = vpop.permute.xlu0 %1271  ;;  %v1281_v6 = vsel %vm1279_vm9, %v1274_v2, %v1276_v22 }
 0x325   : > { %2908 = vrot.lane.b32.xlu1 %v2907_v38, %s3154_s15  ;;  %v2912_v20 = vpack.i.bf16 %v4048_v34, %v4053_v47  ;;  %v1332_v49 = vrot.slane %v1281_v6, 7  ;;  %v1282_v27 = vsel %vm1279_vm9, %v1272_v31, %v1274_v2 }
 0x327   : > { %v1335_v33 = vsel %vm1005_vm2, %v1282_v27, %v1332_v49 }
 0x32b   : > { %1380 = vrot.lane.b32.xlu0 %v3410_v53, %s3155_s13  ;;  %2913 = vrot.lane.b32.xlu2 %v2912_v20, %s3154_s15 }
 0x32c   : > { %v1278_v39 = vpop.permute.xlu0 %1277 }
 0x32d   : > { %1382 = vrot.lane.b32.xlu1 %v3415_v54, %s3155_s13  ;;  %v1280_v37 = vsel %vm1279_vm9, %v1276_v22, %v1278_v39  ;;  %v1283_v44 = vsel %vm1279_vm9, %v1278_v39, %v1272_v31 }
 0x32e   : > { %v1333_v46 = vrot.slane %v1280_v37, 6  ;;  %v1334_v42 = vrot.slane %v1283_v44, 5 }
 0x330   : > { %v1336_v5 = vsel %vm1007_vm3, %v1333_v46, %v1334_v42 }
 0x331   : > { %v1337_v50 = vsel %vm1009_vm4, %v1335_v33, %v1336_v5 }
 0x332   : > { %vm1338_vm10 = vcmp.eq.s32.totalorder %v3407_v52, %v1337_v50 }
 0x333   : > { %1386 = vrot.lane.b32.xlu0 %v3418_v55, %s3155_s13  ;;  %1384 = vrot.lane.b32.xlu2 %v3425_v58, %s3155_s13  ;;  %v1355_v36 = vsel %vm1338_vm10, 1, %v3150_v7 }
 0x334   : > { %v1358_v3 = vperm.slane %v1355_v36, 2  ;;  %v1359_v8 = vperm.slane %v1355_v36, 3  ;;  %v1356_v14 = vperm.slane %v1355_v36, 0  ;;  %v1357_v13 = vperm.slane %v1355_v36, 1 }
 0x336   : > { %vm4089_vm11 = vcmp.eq.s32.totalorder %v1358_v3, 1  ;;  %vm4096_vm12 = vcmp.eq.s32.totalorder %v1359_v8, 1  ;;  %vm4100_vm13 = vcmp.eq.s32.totalorder %v1356_v14, 1  ;;  %vm4104_vm14 = vcmp.eq.s32.totalorder %v1357_v13, 1 }
 0x36c   : > { %v2894_v57 = vpop.permute.xlu2 %2893 }
 0x36d   : > { %v2896_v59 = vunpack.i.h.bf16 %v2894_v57  ;;  %v2895_v35 = vunpack.i.l.bf16 %v2894_v57 }
 0x36f   : > { %v1319_v62 = vsel %vm1279_vm9, %v2895_v35, %v2896_v59 }
 0x370   : > { %v1353_v11 = vmax.f32 %v3921_v18, %v1319_v62 }
 0x372   : > { %v4111_v38 = vsel %vm4089_vm11, %v1353_v11, %v3921_v18 }
 0x37d   : > { %v2899_v40 = vpop.permute.xlu2 %2898 }
 0x37e   : > { %v2900_v46 = vunpack.i.l.bf16 %v2899_v40 }
 0x384   : > { %v2884_v0 = vpop.permute.xlu1 %2883 }
 0x385   : > { %v2886_v1 = vunpack.i.h.bf16 %v2884_v0  ;;  %v2885_v9 = vunpack.i.l.bf16 %v2884_v0 }
 0x387   : > { %v1323_v29 = vsel %vm1279_vm9, %v2886_v1, %v2895_v35  ;;  %v1327_v52 = vsel %vm1279_vm9, %v2885_v9, %v2886_v1  ;;  %v1331_v51 = vsel %vm1279_vm9, %v2896_v59, %v2885_v9 }
 0x388   : > { %v1352_v23 = vmax.f32 %v3936_v17, %v1323_v29  ;;  %v1351_v56 = vmax.f32 %v3931_v12, %v1327_v52  ;;  %v1354_v24 = vmax.f32 %v3926_v10, %v1331_v51 }
 0x38a   : > { %v4116_v63 = vsel %vm4096_vm12, %v1354_v24, %v3926_v10  ;;  %v4121_v20 = vsel %vm4100_vm13, %v1351_v56, %v3931_v12  ;;  %v4126_v31 = vsel %vm4104_vm14, %v1352_v23, %v3936_v17  ;;  %v2901_v12 = vunpack.i.h.bf16 %v2899_v40 }
 0x38b   : > { %v2932_v39 = vpack.i.bf16 %v4116_v63, %v4111_v38  ;;  %v2922_v18 = vpack.i.bf16 %v4126_v31, %v4121_v20 }
 0x38c   : > { %v1325_v3 = vsel %vm1279_vm9, %v2900_v46, %v2901_v12 }
 0x38d   : > { %v2879_v2 = vpop.permute.xlu0 %2878  ;;  %v2889_v22 = vpop.permute.xlu1 %2888  ;;  %2933 = vrot.lane.b32.xlu2 %v2932_v39, %s3155_s13  ;;  %2923 = vrot.lane.b32.xlu1 %v2922_v18, %s3155_s13 }
 0x38e   : > { %v2881_v10 = vunpack.i.h.bf16 %v2879_v2  ;;  %v2880_v37 = vunpack.i.l.bf16 %v2879_v2  ;;  %v2891_v44 = vunpack.i.h.bf16 %v2889_v22  ;;  %v2890_v6 = vunpack.i.l.bf16 %v2889_v22 }
 0x390   : > { %v1326_v17 = vsel %vm1279_vm9, %v2880_v37, %v2881_v10  ;;  %v1330_v42 = vsel %vm1279_vm9, %v2891_v44, %v2880_v37  ;;  %v1318_v49 = vsel %vm1279_vm9, %v2890_v6, %v2891_v44  ;;  %v1322_v27 = vsel %vm1279_vm9, %v2881_v10, %v2890_v6 }
 0x391   : > { %v1347_v5 = vmax.f32 %v3959_v45, %v1326_v17  ;;  %v1350_v33 = vmax.f32 %v3974_v43, %v1330_v42  ;;  %v1348_v50 = vmax.f32 %v3964_v28, %v1322_v27  ;;  %v1349_v57 = vmax.f32 %v3969_v48, %v1318_v49 }
 0x393   : > { %v4149_v59 = vsel %vm4100_vm13, %v1347_v5, %v3959_v45  ;;  %v4154_v35 = vsel %vm4104_vm14, %v1348_v50, %v3964_v28  ;;  %v4159_v36 = vsel %vm4089_vm11, %v1349_v57, %v3969_v48  ;;  %v4164_v62 = vsel %vm4096_vm12, %v1350_v33, %v3974_v43  ;;  %v2914_v45 = vpop.permute.xlu2 %2913 }
 0x394   : > { %v2917_v0 = vpack.i.bf16 %v4154_v35, %v4149_v59  ;;  %v2927_v28 = vpack.i.bf16 %v4164_v62, %v4159_v36  ;;  %v1343_v48 = vmax.f32 %v4017_v26, %v1325_v3  ;;  %v2916_v43 = vunpack.i.h.bf16 %v2914_v45 }
 0x395   : > { %v2904_v8 = vpop.permute.xlu0 %2903  ;;  %v2915_v14 = vunpack.i.l.bf16 %v2914_v45 }
 0x396   : > { %v2906_v1 = vunpack.i.h.bf16 %v2904_v8  ;;  %v2905_v9 = vunpack.i.l.bf16 %v2904_v8  ;;  %2918 = vrot.lane.b32.xlu0 %v2917_v0, %s3155_s13  ;;  %2928 = vrot.lane.b32.xlu1 %v2927_v28, %s3155_s13  ;;  %v4205_v6 = vsel %vm4100_vm13, %v1343_v48, %v4017_v26 }
 0x397   : > { %v2909_v13 = vpop.permute.xlu1 %2908 }
 0x398   : > { %v1317_v11 = vsel %vm1279_vm9, %v2905_v9, %v2906_v1  ;;  %v1321_v29 = vsel %vm1279_vm9, %v2901_v12, %v2905_v9  ;;  %v1329_v52 = vsel %vm1279_vm9, %v2906_v1, %v2900_v46  ;;  %v2911_v51 = vunpack.i.h.bf16 %v2909_v13  ;;  %v4269_v1 = vld [vmem:[%s3336_s1] sm:$0xf]  ;;  %s3157_s1 = smov 64  }
 0x399   : > { %v1344_v23 = vmax.f32 %v4022_v41, %v1321_v29  ;;  %v1345_v56 = vmax.f32 %v4005_v21, %v1317_v11  ;;  %v1346_v24 = vmax.f32 %v4010_v25, %v1329_v52  ;;  %v2910_v40 = vunpack.i.l.bf16 %v2909_v13 }
 0x39a   : > { %v1320_v39 = vsel %vm1279_vm9, %v2911_v51, %v2915_v14 }
 0x39b   : > { %v1340_v18 = vmax.f32 %v4027_v15, %v1320_v39  ;;  %v1324_v2 = vsel %vm1279_vm9, %v2910_v40, %v2911_v51  ;;  %v1328_v22 = vsel %vm1279_vm9, %v2916_v43, %v2910_v40  ;;  %v4194_v10 = vsel %vm4089_vm11, %v1345_v56, %v4005_v21  ;;  %v1385_v16 = vpop.permute.xlu2 %1384 }
 0x39c   : > { %v1339_v37 = vmax.f32 %v4036_v19, %v1324_v2  ;;  %v4200_v44 = vsel %vm4096_vm12, %v1346_v24, %v4010_v25  ;;  %v4210_v12 = vsel %vm4104_vm14, %v1344_v23, %v4022_v41  ;;  %v1316_v21 = vsel %vm1279_vm9, %v2915_v14, %v2916_v43 }
 0x39d   : > { %v2942_v46 = vpack.i.bf16 %v4200_v44, %v4194_v10  ;;  %v2937_v25 = vpack.i.bf16 %v4210_v12, %v4205_v6  ;;  %v4221_v17 = vsel %vm4104_vm14, %v1340_v18, %v4027_v15  ;;  %v1342_v26 = vmax.f32 %v4048_v34, %v1328_v22 }
 0x39e   : > { %v4227_v41 = vsel %vm4100_vm13, %v1339_v37, %v4036_v19  ;;  %v1341_v49 = vmax.f32 %v4053_v47, %v1316_v21  ;;  %vm1606_vm14 = vcmp.lt.s32.totalorder %v3494_v61, 64 }
 0x39f   : > { %2943 = vrot.lane.b32.xlu0 %v2942_v46, %s3155_s13  ;;  %2938 = vrot.lane.b32.xlu2 %v2937_v25, %s3155_s13  ;;  %v2947_v42 = vpack.i.bf16 %v4221_v17, %v4227_v41  ;;  %v4238_v15 = vsel %vm4096_vm12, %v1342_v26, %v4048_v34  ;;  %v1381_v34 = vpop.permute.xlu0 %1380  ;;  %v1383_v4 = vpop.permute.xlu1 %1382 }
 0x3a0   : > { %v4243_v19 = vsel %vm4089_vm11, %v1341_v49, %v4053_v47  ;;  %v1390_v5 = vsel %vm1388_vm15, %v1383_v4, %v1385_v16  ;;  %v1391_v3 = vsel %vm1388_vm15, %v1381_v34, %v1383_v4 }
 0x3a1   : > { %2948 = vrot.lane.b32.xlu1 %v2947_v42, %s3155_s13  ;;  %v2952_v30 = vpack.i.bf16 %v4238_v15, %v4243_v19  ;;  %v1441_v57 = vrot.slane %v1390_v5, 7 }
 0x3a3   : > { %v1444_v0 = vsel %vm1005_vm2, %v1391_v3, %v1441_v57 }
 0x3a7   : > { %2953 = vrot.lane.b32.xlu2 %v2952_v30, %s3155_s13  ;;  %1489 = vrot.lane.b32.xlu0 %v3410_v53, %s3156_s20  ;;  %v1387_v47 = vpop.permute.xlu0 %1386 }
 0x3a8   : > { %v1389_v32 = vsel %vm1388_vm15, %v1385_v16, %v1387_v47  ;;  %v1392_v27 = vsel %vm1388_vm15, %v1387_v47, %v1381_v34 }
 0x3a9   : > { %1491 = vrot.lane.b32.xlu1 %v3415_v54, %s3156_s20  ;;  %v1442_v33 = vrot.slane %v1389_v32, 6  ;;  %v1443_v50 = vrot.slane %v1392_v27, 5 }
 0x3ab   : > { %v1445_v45 = vsel %vm1007_vm3, %v1442_v33, %v1443_v50 }
 0x3ac   : > { %v1446_v28 = vsel %vm1009_vm4, %v1444_v0, %v1445_v45 }
 0x3ad   : > { %vm1447_vm0 = vcmp.eq.s32.totalorder %v4269_v1, %v1446_v28 }
 0x3ae   : > { %v1464_v43 = vsel %vm1447_vm0, 1, %v3150_v7 }
 0x3af   : > { %1495 = vrot.lane.b32.xlu0 %v3418_v55, %s3156_s20  ;;  %1493 = vrot.lane.b32.xlu2 %v3425_v58, %s3156_s20  ;;  %v1467_v13 = vperm.slane %v1464_v43, 2  ;;  %v1468_v29 = vperm.slane %v1464_v43, 3  ;;  %v1465_v23 = vperm.slane %v1464_v43, 0  ;;  %v1466_v56 = vperm.slane %v1464_v43, 1 }
 0x3b1   : > { %vm4282_vm1 = vcmp.eq.s32.totalorder %v1467_v13, 1  ;;  %vm4289_vm5 = vcmp.eq.s32.totalorder %v1468_v29, 1  ;;  %vm4293_vm6 = vcmp.eq.s32.totalorder %v1465_v23, 1  ;;  %vm4297_vm7 = vcmp.eq.s32.totalorder %v1466_v56, 1 }
 0x3e7   : > { %v2934_v8 = vpop.permute.xlu2 %2933 }
 0x3e8   : > { %v2936_v9 = vunpack.i.h.bf16 %v2934_v8  ;;  %v2935_v48 = vunpack.i.l.bf16 %v2934_v8 }
 0x3ea   : > { %v1428_v14 = vsel %vm1388_vm15, %v2935_v48, %v2936_v9 }
 0x3eb   : > { %v1462_v24 = vmax.f32 %v4111_v38, %v1428_v14 }
 0x3ed   : > { %v4304_v49 = vsel %vm4282_vm1, %v1462_v24, %v4111_v38 }
 0x3f9   : > { %v2939_v42 = vpop.permute.xlu2 %2938 }
 0x3fa   : > { %v2940_v50 = vunpack.i.l.bf16 %v2939_v42 }
 0x3ff   : > { %v2924_v11 = vpop.permute.xlu1 %2923 }
 0x400   : > { %v2926_v52 = vunpack.i.h.bf16 %v2924_v11  ;;  %v2925_v51 = vunpack.i.l.bf16 %v2924_v11 }
 0x401   : > { %v2954_v29 = vpop.permute.xlu2 %2953 }
 0x402   : > { %v1432_v40 = vsel %vm1388_vm15, %v2926_v52, %v2935_v48  ;;  %v1436_v39 = vsel %vm1388_vm15, %v2925_v51, %v2926_v52  ;;  %v1440_v18 = vsel %vm1388_vm15, %v2936_v9, %v2925_v51  ;;  %v2956_v23 = vunpack.i.h.bf16 %v2954_v29 }
 0x403   : > { %v1461_v22 = vmax.f32 %v4126_v31, %v1432_v40  ;;  %v1460_v37 = vmax.f32 %v4121_v20, %v1436_v39  ;;  %v1463_v21 = vmax.f32 %v4116_v63, %v1440_v18  ;;  %v2955_v56 = vunpack.i.l.bf16 %v2954_v29 }
 0x405   : > { %v4309_v30 = vsel %vm4289_vm5, %v1463_v21, %v4116_v63  ;;  %v4314_v34 = vsel %vm4293_vm6, %v1460_v37, %v4121_v20  ;;  %v4319_v47 = vsel %vm4297_vm7, %v1461_v22, %v4126_v31  ;;  %v2941_v20 = vunpack.i.h.bf16 %v2939_v42 }
 0x406   : > { %v2972_v4 = vpack.i.bf16 %v4309_v30, %v4304_v49  ;;  %v2962_v38 = vpack.i.bf16 %v4319_v47, %v4314_v34 }
 0x408   : > { %v2919_v16 = vpop.permute.xlu0 %2918  ;;  %v2929_v32 = vpop.permute.xlu1 %2928  ;;  %2973 = vrot.lane.b32.xlu2 %v2972_v4, %s3156_s20  ;;  %2963 = vrot.lane.b32.xlu1 %v2962_v38, %s3156_s20 }
 0x409   : > { %v2921_v63 = vunpack.i.h.bf16 %v2919_v16  ;;  %v2920_v27 = vunpack.i.l.bf16 %v2919_v16  ;;  %v2931_v5 = vunpack.i.h.bf16 %v2929_v32  ;;  %v2930_v33 = vunpack.i.l.bf16 %v2929_v32  ;;  %v1494_v46 = vpop.permute.xlu2 %1493 }
 0x40b   : > { %v1435_v31 = vsel %vm1388_vm15, %v2920_v27, %v2921_v63  ;;  %v1439_v57 = vsel %vm1388_vm15, %v2931_v5, %v2920_v27  ;;  %v1427_v3 = vsel %vm1388_vm15, %v2930_v33, %v2931_v5  ;;  %v1431_v45 = vsel %vm1388_vm15, %v2921_v63, %v2930_v33 }
 0x40c   : > { %v1456_v0 = vmax.f32 %v4149_v59, %v1435_v31  ;;  %v1459_v28 = vmax.f32 %v4164_v62, %v1439_v57  ;;  %v1457_v8 = vmax.f32 %v4154_v35, %v1431_v45  ;;  %v1458_v9 = vmax.f32 %v4159_v36, %v1427_v3 }
 0x40e   : > { %v4342_v48 = vsel %vm4293_vm6, %v1456_v0, %v4149_v59  ;;  %v4347_v43 = vsel %vm4297_vm7, %v1457_v8, %v4154_v35  ;;  %v4352_v14 = vsel %vm4282_vm1, %v1458_v9, %v4159_v36  ;;  %v4357_v13 = vsel %vm4289_vm5, %v1459_v28, %v4164_v62 }
 0x40f   : > { %v2957_v11 = vpack.i.bf16 %v4347_v43, %v4342_v48  ;;  %v2967_v59 = vpack.i.bf16 %v4357_v13, %v4352_v14  ;;  %v1434_v35 = vsel %vm1388_vm15, %v2940_v50, %v2941_v20 }
 0x410   : > { %v1452_v62 = vmax.f32 %v4205_v6, %v1434_v35 }
 0x411   : > { %v2944_v52 = vpop.permute.xlu0 %2943  ;;  %2958 = vrot.lane.b32.xlu0 %v2957_v11, %s3156_s20  ;;  %2968 = vrot.lane.b32.xlu1 %v2967_v59, %s3156_s20 }
 0x412   : > { %v2946_v36 = vunpack.i.h.bf16 %v2944_v52  ;;  %v2945_v51 = vunpack.i.l.bf16 %v2944_v52 }
 0x413   : > { %v2949_v24 = vpop.permute.xlu1 %2948 }
 0x414   : > { %v1426_v40 = vsel %vm1388_vm15, %v2945_v51, %v2946_v36  ;;  %v1430_v39 = vsel %vm1388_vm15, %v2941_v20, %v2945_v51  ;;  %v1438_v18 = vsel %vm1388_vm15, %v2946_v36, %v2940_v50  ;;  %v2951_v22 = vunpack.i.h.bf16 %v2949_v24 }
 0x415   : > { %v1453_v37 = vmax.f32 %v4210_v12, %v1430_v39  ;;  %v1454_v21 = vmax.f32 %v4194_v10, %v1426_v40  ;;  %v1455_v42 = vmax.f32 %v4200_v44, %v1438_v18  ;;  %v2950_v4 = vunpack.i.l.bf16 %v2949_v24 }
 0x416   : > { %v1429_v38 = vsel %vm1388_vm15, %v2951_v22, %v2955_v56  ;;  %v4398_v20 = vsel %vm4293_vm6, %v1452_v62, %v4205_v6 }
 0x417   : > { %v1449_v16 = vmax.f32 %v4221_v17, %v1429_v38  ;;  %v1433_v32 = vsel %vm1388_vm15, %v2950_v4, %v2951_v22  ;;  %v1437_v63 = vsel %vm1388_vm15, %v2956_v23, %v2950_v4  ;;  %v4387_v27 = vsel %vm4282_vm1, %v1454_v21, %v4194_v10 }
 0x418   : > { %v1448_v5 = vmax.f32 %v4227_v41, %v1433_v32  ;;  %v4393_v33 = vsel %vm4289_vm5, %v1455_v42, %v4200_v44  ;;  %v4403_v50 = vsel %vm4297_vm7, %v1453_v37, %v4210_v12  ;;  %v1425_v10 = vsel %vm1388_vm15, %v2955_v56, %v2956_v23 }
 0x419   : > { %v2982_v31 = vpack.i.bf16 %v4393_v33, %v4387_v27  ;;  %v2977_v44 = vpack.i.bf16 %v4403_v50, %v4398_v20  ;;  %v4414_v57 = vsel %vm4297_vm7, %v1449_v16, %v4221_v17  ;;  %v1451_v6 = vmax.f32 %v4238_v15, %v1437_v63 }
 0x41a   : > { %v4420_v12 = vsel %vm4293_vm6, %v1448_v5, %v4227_v41  ;;  %v1450_v45 = vmax.f32 %v4243_v19, %v1425_v10 }
 0x41b   : > { %2983 = vrot.lane.b32.xlu0 %v2982_v31, %s3156_s20  ;;  %2978 = vrot.lane.b32.xlu2 %v2977_v44, %s3156_s20  ;;  %v2987_v3 = vpack.i.bf16 %v4414_v57, %v4420_v12  ;;  %v4431_v17 = vsel %vm4289_vm5, %v1451_v6, %v4238_v15  ;;  %v1490_v15 = vpop.permute.xlu0 %1489  ;;  %v1492_v2 = vpop.permute.xlu1 %1491 }
 0x41c   : > { %v4436_v41 = vsel %vm4282_vm1, %v1450_v45, %v4243_v19  ;;  %v1499_v28 = vsel %vm1497_vm8, %v1492_v2, %v1494_v46  ;;  %v1500_v59 = vsel %vm1497_vm8, %v1490_v15, %v1492_v2 }
 0x41d   : > { %2988 = vrot.lane.b32.xlu1 %v2987_v3, %s3156_s20  ;;  %v2992_v25 = vpack.i.bf16 %v4431_v17, %v4436_v41  ;;  %v1550_v11 = vrot.slane %v1499_v28, 7 }
 0x41f   : > { %v1553_v29 = vsel %vm1005_vm2, %v1500_v59, %v1550_v11 }
 0x423   : > { %2993 = vrot.lane.b32.xlu2 %v2992_v25, %s3156_s20  ;;  %1598 = vrot.lane.b32.xlu0 %v3410_v53, %s3157_s1  ;;  %v1496_v19 = vpop.permute.xlu0 %1495 }
 0x424   : > { %v1498_v26 = vsel %vm1497_vm8, %v1494_v46, %v1496_v19  ;;  %v1501_v0 = vsel %vm1497_vm8, %v1496_v19, %v1490_v15 }
 0x425   : > { %1600 = vrot.lane.b32.xlu1 %v3415_v54, %s3157_s1  ;;  %v1551_v8 = vrot.slane %v1498_v26, 6  ;;  %v1552_v9 = vrot.slane %v1501_v0, 5 }
 0x427   : > { %v1554_v35 = vsel %vm1007_vm3, %v1551_v8, %v1552_v9 }
 0x428   : > { %v1555_v52 = vsel %vm1009_vm4, %v1553_v29, %v1554_v35 }
 0x429   : > { %vm1556_vm9 = vcmp.eq.s32.totalorder %v4269_v1, %v1555_v52 }
 0x42a   : > { %v1573_v23 = vsel %vm1556_vm9, 1, %v3150_v7 }
 0x42b   : > { %1604 = vrot.lane.b32.xlu0 %v3418_v55, %s3157_s1  ;;  %1602 = vrot.lane.b32.xlu2 %v3425_v58, %s3157_s1  ;;  %v1576_v24 = vperm.slane %v1573_v23, 2  ;;  %v1574_v39 = vperm.slane %v1573_v23, 0  ;;  %v1577_v37 = vperm.slane %v1573_v23, 3  ;;  %v1575_v21 = vperm.slane %v1573_v23, 1 }
 0x42d   : > { %vm4472_vm10 = vcmp.eq.s32.totalorder %v1576_v24, 1  ;;  %vm4479_vm11 = vcmp.eq.s32.totalorder %v1577_v37, 1  ;;  %vm4483_vm12 = vcmp.eq.s32.totalorder %v1574_v39, 1  ;;  %vm4487_vm13 = vcmp.eq.s32.totalorder %v1575_v21, 1 }
 0x462   : > { %v2974_v36 = vpop.permute.xlu2 %2973 }
 0x463   : > { %v2976_v51 = vunpack.i.h.bf16 %v2974_v36  ;;  %v2975_v62 = vunpack.i.l.bf16 %v2974_v36 }
 0x465   : > { %v1537_v56 = vsel %vm1497_vm8, %v2975_v62, %v2976_v51 }
 0x466   : > { %v1571_v42 = vmax.f32 %v4304_v49, %v1537_v56 }
 0x468   : > { %v4494_v3 = vsel %vm4472_vm10, %v1571_v42, %v4304_v49 }
 0x475   : > { %v2979_v19 = vpop.permute.xlu2 %2978 }
 0x476   : > { %v2981_v36 = vunpack.i.h.bf16 %v2979_v19 }
 0x47a   : > { %v2964_v40 = vpop.permute.xlu1 %2963 }
 0x47b   : > { %v2966_v18 = vunpack.i.h.bf16 %v2964_v40  ;;  %v2965_v22 = vunpack.i.l.bf16 %v2964_v40 }
 0x47d   : > { %v1541_v4 = vsel %vm1497_vm8, %v2966_v18, %v2975_v62  ;;  %v1545_v38 = vsel %vm1497_vm8, %v2965_v22, %v2966_v18  ;;  %v1549_v16 = vsel %vm1497_vm8, %v2976_v51, %v2965_v22  ;;  %v2980_v51 = vunpack.i.l.bf16 %v2979_v19  ;;  %v2994_v39 = vpop.permute.xlu2 %2993 }
 0x47e   : > { %v1570_v63 = vmax.f32 %v4319_v47, %v1541_v4  ;;  %v1569_v5 = vmax.f32 %v4314_v34, %v1545_v38  ;;  %v1572_v10 = vmax.f32 %v4309_v30, %v1549_v16  ;;  %v2996_v37 = vunpack.i.h.bf16 %v2994_v39 }
 0x47f   : > { %v2995_v21 = vunpack.i.l.bf16 %v2994_v39  ;;  %v1708_v39 = vrot.slane %v3418_v55, 6 }
 0x480   : > { %v4499_v45 = vsel %vm4479_vm11, %v1572_v10, %v4309_v30  ;;  %v4504_v25 = vsel %vm4483_vm12, %v1569_v5, %v4314_v34  ;;  %v4509_v15 = vsel %vm4487_vm13, %v1570_v63, %v4319_v47 }
 0x481   : > { %v3012_v49 = vpack.i.bf16 %v4499_v45, %v4494_v3  ;;  %v3002_v2 = vpack.i.bf16 %v4509_v15, %v4504_v25 }
 0x483   : > { %v2959_v46 = vpop.permute.xlu0 %2958  ;;  %v2969_v30 = vpop.permute.xlu1 %2968  ;;  %3013 = vrot.lane.b32.xlu2 %v3012_v49, %s3157_s1  ;;  %3003 = vrot.lane.b32.xlu1 %v3002_v2, %s3157_s1 }
 0x484   : > { %v2961_v26 = vunpack.i.h.bf16 %v2959_v46  ;;  %v2960_v0 = vunpack.i.l.bf16 %v2959_v46  ;;  %v2971_v28 = vunpack.i.h.bf16 %v2969_v30  ;;  %v2970_v8 = vunpack.i.l.bf16 %v2969_v30 }
 0x486   : > { %v1544_v34 = vsel %vm1497_vm8, %v2960_v0, %v2961_v26  ;;  %v1548_v47 = vsel %vm1497_vm8, %v2971_v28, %v2960_v0  ;;  %v1536_v9 = vsel %vm1497_vm8, %v2970_v8, %v2971_v28  ;;  %v1540_v11 = vsel %vm1497_vm8, %v2961_v26, %v2970_v8 }
 0x487   : > { %v1565_v59 = vmax.f32 %v4342_v48, %v1544_v34  ;;  %v1568_v35 = vmax.f32 %v4357_v13, %v1548_v47  ;;  %v1566_v29 = vmax.f32 %v4347_v43, %v1540_v11  ;;  %v1567_v52 = vmax.f32 %v4352_v14, %v1536_v9 }
 0x489   : > { %v4532_v62 = vsel %vm4483_vm12, %v1565_v59, %v4342_v48  ;;  %v4537_v23 = vsel %vm4487_vm13, %v1566_v29, %v4347_v43  ;;  %v4542_v56 = vsel %vm4472_vm10, %v1567_v52, %v4352_v14  ;;  %v4547_v24 = vsel %vm4479_vm11, %v1568_v35, %v4357_v13 }
 0x48a   : > { %v2997_v40 = vpack.i.bf16 %v4537_v23, %v4532_v62  ;;  %v3007_v48 = vpack.i.bf16 %v4547_v24, %v4542_v56  ;;  %v1543_v43 = vsel %vm1497_vm8, %v2980_v51, %v2981_v36 }
 0x48b   : > { %v1561_v13 = vmax.f32 %v4398_v20, %v1543_v43  ;;  %v1707_v43 = vrot.slane %v3425_v58, 7 }
 0x48c   : > { %2998 = vrot.lane.b32.xlu0 %v2997_v40, %s3157_s1  ;;  %3008 = vrot.lane.b32.xlu1 %v3007_v48, %s3157_s1 }
 0x48d   : > { %v2984_v14 = vpop.permute.xlu0 %2983  ;;  %v4588_v34 = vsel %vm4483_vm12, %v1561_v13, %v4398_v20  ;;  %v1710_v13 = vsel %vm1005_vm2, %v3415_v54, %v1707_v43 }
 0x48e   : > { %v2986_v18 = vunpack.i.h.bf16 %v2984_v14  ;;  %v2985_v22 = vunpack.i.l.bf16 %v2984_v14  ;;  %v1709_v14 = vrot.slane %v3410_v53, 5 }
 0x48f   : > { %v2989_v42 = vpop.permute.xlu1 %2988 }
 0x490   : > { %v1535_v4 = vsel %vm1497_vm8, %v2985_v22, %v2986_v18  ;;  %v1539_v38 = vsel %vm1497_vm8, %v2981_v36, %v2985_v22  ;;  %v1547_v16 = vsel %vm1497_vm8, %v2986_v18, %v2980_v51  ;;  %v2991_v63 = vunpack.i.h.bf16 %v2989_v42  ;;  %v1603_v36 = vpop.permute.xlu2 %1602 }
 0x491   : > { %v1562_v5 = vmax.f32 %v4403_v50, %v1539_v38  ;;  %v1563_v10 = vmax.f32 %v4387_v27, %v1535_v4  ;;  %v1564_v19 = vmax.f32 %v4393_v33, %v1547_v16  ;;  %v2990_v49 = vunpack.i.l.bf16 %v2989_v42 }
 0x492   : > { %v1538_v2 = vsel %vm1497_vm8, %v2991_v63, %v2995_v21  ;;  %v1755_v42 = vrot.slane %v3418_v55, 7  ;;  %v1756_v4 = vrot.slane %v3410_v53, 6  ;;  %v1757_v38 = vrot.slane %v3415_v54, 5 }
 0x493   : > { %v1558_v46 = vmax.f32 %v4414_v57, %v1538_v2  ;;  %v1542_v30 = vsel %vm1497_vm8, %v2990_v49, %v2991_v63  ;;  %v1546_v26 = vsel %vm1497_vm8, %v2996_v37, %v2990_v49  ;;  %v4577_v0 = vsel %vm4472_vm10, %v1563_v10, %v4387_v27 }
 0x494   : > { %v1557_v28 = vmax.f32 %v4420_v12, %v1542_v30  ;;  %v4583_v8 = vsel %vm4479_vm11, %v1564_v19, %v4393_v33  ;;  %v4593_v47 = vsel %vm4487_vm13, %v1562_v5, %v4403_v50  ;;  %v1534_v27 = vsel %vm1497_vm8, %v2995_v21, %v2996_v37 }
 0x495   : > { %v3022_v9 = vpack.i.bf16 %v4583_v8, %v4577_v0  ;;  %v3017_v33 = vpack.i.bf16 %v4593_v47, %v4588_v34  ;;  %v4604_v11 = vsel %vm4487_vm13, %v1558_v46, %v4414_v57  ;;  %v1560_v20 = vmax.f32 %v4431_v17, %v1546_v26  ;;  %v1599_v6 = vpop.permute.xlu0 %1598 }
 0x496   : > { %v4610_v50 = vsel %vm4483_vm12, %v1557_v28, %v4420_v12  ;;  %v1559_v35 = vmax.f32 %v4436_v41, %v1534_v27  ;;  %v1711_v37 = vsel %vm1007_vm3, %v1708_v39, %v1709_v14  ;;  %v1758_v5 = vsel %vm1005_vm2, %v3425_v58, %v1755_v42 }
 0x497   : > { %3023 = vrot.lane.b32.xlu0 %v3022_v9, %s3157_s1  ;;  %3018 = vrot.lane.b32.xlu2 %v3017_v33, %s3157_s1  ;;  %v3027_v59 = vpack.i.bf16 %v4604_v11, %v4610_v50  ;;  %v4621_v57 = vsel %vm4479_vm11, %v1560_v20, %v4431_v17  ;;  %v1601_v52 = vpop.permute.xlu1 %1600  ;;  %v1712_v16 = vsel %vm1009_vm4, %v1710_v13, %v1711_v37 }
 0x498   : > { %v4626_v12 = vsel %vm4472_vm10, %v1559_v35, %v4436_v41  ;;  %v1608_v41 = vsel %vm1606_vm14, %v1601_v52, %v1603_v36  ;;  %v1609_v48 = vsel %vm1606_vm14, %v1599_v6, %v1601_v52  ;;  %v1759_v10 = vsel %vm1007_vm3, %v1756_v4, %v1757_v38 }
 0x499   : > { %3028 = vrot.lane.b32.xlu1 %v3027_v59, %s3157_s1  ;;  %v3032_v44 = vpack.i.bf16 %v4621_v57, %v4626_v12  ;;  %v1659_v40 = vrot.slane %v1608_v41, 7  ;;  %vm1713_vm0 = vcmp.eq.s32.totalorder %v4269_v1, %v1712_v16  ;;  %v1760_v53 = vsel %vm1009_vm4, %v1758_v5, %v1759_v10 }
 0x49a   : > { %v1730_v54 = vsel %vm1713_vm0, 1, %v3150_v7  ;;  %vm1761_vm1 = vcmp.eq.s32.totalorder %v4269_v1, %v1760_v53 }
 0x49b   : > { %v1662_v22 = vsel %vm1005_vm2, %v1609_v48, %v1659_v40  ;;  %v1731_v28 = vperm.slane %v1730_v54, 0  ;;  %v1770_v20 = vsel %vm1761_vm1, 1, %v3150_v7 }
 0x49c   : > { %v1771_v41 = vperm.slane %v1770_v20, 0 }
 0x49d   : > { %v1605_v29 = vpop.permute.xlu0 %1604  ;;  %vm4684_vm6 = vcmp.eq.s32.totalorder %v1731_v28, 1 }
 0x49e   : > { %v1607_v17 = vsel %vm1606_vm14, %v1603_v36, %v1605_v29  ;;  %v1610_v31 = vsel %vm1606_vm14, %v1605_v29, %v1599_v6  ;;  %v1733_v6 = vperm.slane %v1730_v54, 2  ;;  %v1732_v29 = vperm.slane %v1730_v54, 1 }
 0x49f   : > { %3033 = vrot.lane.b32.xlu2 %v3032_v44, %s3157_s1  ;;  %v1660_v32 = vrot.slane %v1607_v17, 6  ;;  %v1661_v51 = vrot.slane %v1610_v31, 5  ;;  %v1734_v31 = vperm.slane %v1730_v54, 3  ;;  %vm4723_vm10 = vcmp.eq.s32.totalorder %v1771_v41, 1 }
 0x4a0   : > { %vm4702_vm7 = vcmp.eq.s32.totalorder %v1733_v6, 1  ;;  %vm4706_vm8 = vcmp.eq.s32.totalorder %v1732_v29, 1 }
 0x4a1   : > { %v1663_v18 = vsel %vm1007_vm3, %v1660_v32, %v1661_v51  ;;  %v1773_v32 = vperm.slane %v1770_v20, 2  ;;  %v1774_v51 = vperm.slane %v1770_v20, 3  ;;  %vm4710_vm9 = vcmp.eq.s32.totalorder %v1734_v31, 1 }
 0x4a2   : > { %v1664_v21 = vsel %vm1009_vm4, %v1662_v22, %v1663_v18 }
 0x4a3   : > { %vm1665_vm15 = vcmp.eq.s32.totalorder %v4269_v1, %v1664_v21  ;;  %vm4739_vm12 = vcmp.eq.s32.totalorder %v1773_v32, 1  ;;  %vm4743_vm13 = vcmp.eq.s32.totalorder %v1774_v51, 1 }
 0x4a4   : > { %v1682_v19 = vsel %vm1665_vm15, 1, %v3150_v7  ;;  %v1772_v7 = vperm.slane %v1770_v20, 1 }
 0x4a5   : > { %v1684_v2 = vperm.slane %v1682_v19, 1  ;;  %v1685_v46 = vperm.slane %v1682_v19, 2  ;;  %v1686_v30 = vperm.slane %v1682_v19, 3  ;;  %v1683_v26 = vperm.slane %v1682_v19, 0 }
 0x4a6   : > { %vm4727_vm11 = vcmp.eq.s32.totalorder %v1772_v7, 1 }
 0x4a7   : > { %vm4664_vm2 = vcmp.eq.s32.totalorder %v1684_v2, 1  ;;  %vm4668_vm3 = vcmp.eq.s32.totalorder %v1685_v46, 1  ;;  %vm4672_vm4 = vcmp.eq.s32.totalorder %v1686_v30, 1  ;;  %vm4680_vm5 = vcmp.eq.s32.totalorder %v1683_v26, 1 }
 0x4dd   : > { %v3014_v63 = vpop.permute.xlu2 %3013 }
 0x4de   : > { %v3016_v49 = vunpack.i.h.bf16 %v3014_v63  ;;  %v3015_v55 = vunpack.i.l.bf16 %v3014_v63  ;;  %v3158_v63 = vmov 1.0  }
 0x4e0   : > { %v1646_v58 = vsel %vm1606_vm14, %v3015_v55, %v3016_v49 }
 0x4e1   : > { %v1680_v1 = vmax.f32 %v4494_v3, %v1646_v58 }
 0x4e3   : > { %v1705_v37 = vsel %vm4668_vm3, %v1680_v1, %v4494_v3 }
 0x4f1   : > { %v4678_v59 = vpop.permute.xlu2 %3018 }
 0x4f2   : > { %v3021_v40 = vunpack.i.h.bf16 %v4678_v59  ;;  %v3020_v14 = vunpack.i.l.bf16 %v4678_v59 }
 0x4f5   : > { %v3004_v35 = vpop.permute.xlu1 %3003 }
 0x4f6   : > { %v3006_v52 = vunpack.i.h.bf16 %v3004_v35  ;;  %v3005_v36 = vunpack.i.l.bf16 %v3004_v35 }
 0x4f8   : > { %v1650_v48 = vsel %vm1606_vm14, %v3006_v52, %v3015_v55  ;;  %v1654_v43 = vsel %vm1606_vm14, %v3005_v36, %v3006_v52  ;;  %v1658_v39 = vsel %vm1606_vm14, %v3016_v49, %v3005_v36 }
 0x4f9   : > { %v1679_v18 = vmax.f32 %v4509_v15, %v1650_v48  ;;  %v1678_v22 = vmax.f32 %v4504_v25, %v1654_v43  ;;  %v1681_v13 = vmax.f32 %v4499_v45, %v1658_v39  ;;  %v4747_v58 = vpop.permute.xlu2 %3033 }
 0x4fa   : > { %v3036_v51 = vunpack.i.h.bf16 %v4747_v58  ;;  %v3035_v48 = vunpack.i.l.bf16 %v4747_v58 }
 0x4fb   : > { %v1704_v38 = vsel %vm4664_vm2, %v1679_v18, %v4509_v15  ;;  %v1706_v3 = vsel %vm4672_vm4, %v1681_v13, %v4499_v45  ;;  %v1703_v16 = vsel %vm4680_vm5, %v1678_v22, %v4504_v25  ;;  %v4737_v45 = vsel %vm1606_vm14, %v3020_v14, %v3021_v40 }
 0x4fc   : > { %v1726_v5 = vmax.f32 %v1703_v16, %v1704_v38  ;;  %v1728_v10 = vmax.f32 %v1705_v37, %v1706_v3  ;;  %v1729_v19 = vmax.f32 %v1706_v3, %v1703_v16  ;;  %v1727_v55 = vmax.f32 %v1704_v38, %v1705_v37 }
 0x4fe   : > { %v2999_v25 = vpop.permute.xlu0 %2998  ;;  %v3009_v15 = vpop.permute.xlu1 %3008  ;;  %v1751_v28 = vsel %vm4684_vm6, %v1726_v5, %v1703_v16  ;;  %v1753_v20 = vsel %vm4702_vm7, %v1728_v10, %v1705_v37  ;;  %v1752_v1 = vsel %vm4706_vm8, %v1727_v55, %v1704_v38  ;;  %v1754_v35 = vsel %vm4710_vm9, %v1729_v19, %v1706_v3 }
 0x4ff   : > { %v3001_v2 = vunpack.i.h.bf16 %v2999_v25  ;;  %v3000_v46 = vunpack.i.l.bf16 %v2999_v25  ;;  %v3011_v30 = vunpack.i.h.bf16 %v3009_v15  ;;  %v3010_v26 = vunpack.i.l.bf16 %v3009_v15 }
 0x500   : > { %v1768_v43 = vmax.f32 %v1751_v28, %v1753_v20  ;;  %v1769_v39 = vmax.f32 %v1752_v1, %v1754_v35  ;;  %v1670_v5 = vmax.f32 %v4588_v34, %v4737_v45  ;;  %v1643_v10 = vsel %vm1606_vm14, %v3035_v48, %v3036_v51  ;;  %v1804_v45 = vld [vmem:[%s631_s19] sm:$0xf] }
 0x501   : > { %v1653_v6 = vsel %vm1606_vm14, %v3000_v46, %v3001_v2  ;;  %v1657_v29 = vsel %vm1606_vm14, %v3011_v30, %v3000_v46  ;;  %v1645_v52 = vsel %vm1606_vm14, %v3010_v26, %v3011_v30  ;;  %v1649_v36 = vsel %vm1606_vm14, %v3001_v2, %v3010_v26 }
 0x502   : > { %v1674_v31 = vmax.f32 %v4532_v62, %v1653_v6  ;;  %v1677_v41 = vmax.f32 %v4547_v24, %v1657_v29  ;;  %v1675_v7 = vmax.f32 %v4537_v23, %v1649_v36  ;;  %v1676_v32 = vmax.f32 %v4542_v56, %v1645_v52 }
 0x503   : > { %v4785_v38 = vsel %vm4723_vm10, %v1768_v43, %v1751_v28  ;;  %v4789_v3 = vsel %vm4727_vm11, %v1769_v39, %v1752_v1  ;;  %v4819_v2 = vstv %s2543_s28  ;;  %v1668_v58 = vmax.f32 %v4626_v12, %v1643_v10 }
 0x504   : > { %v1699_v18 = vsel %vm4680_vm5, %v1674_v31, %v4532_v62  ;;  %v1700_v22 = vsel %vm4664_vm2, %v1675_v7, %v4537_v23  ;;  %v1701_v13 = vsel %vm4668_vm3, %v1676_v32, %v4542_v56  ;;  %v1702_v37 = vsel %vm4672_vm4, %v1677_v41, %v4547_v24  ;;  %2022 = vmatpush.xpose.msra.mxu0 %v4785_v38 }
 0x505   : > { %v4793_v62 = vsel %vm4739_vm12, %v1768_v43, %v1753_v20  ;;  %v4797_v23 = vsel %vm4743_vm13, %v1769_v39, %v1754_v35  ;;  %2063 = vmatpush.xpose.msra.mxu1 %v4789_v3  ;;  %v1722_v56 = vmax.f32 %v1699_v18, %v1700_v22  ;;  %v1724_v24 = vmax.f32 %v1701_v13, %v1702_v37 }
 0x506   : > { %v1725_v16 = vmax.f32 %v1702_v37, %v1699_v18  ;;  %2104 = vmatpush.xpose.msra.mxu2 %v4793_v62  ;;  %2145 = vmatpush.xpose.msra.mxu3 %v4797_v23  ;;  %v1723_v19 = vmax.f32 %v1700_v22, %v1701_v13  ;;  %v1695_v52 = vsel %vm4680_vm5, %v1670_v5, %v4588_v34 }
 0x507   : > { %v1747_v25 = vsel %vm4684_vm6, %v1722_v56, %v1699_v18  ;;  %v1749_v15 = vsel %vm4702_vm7, %v1724_v24, %v1701_v13  ;;  %v1807_v36 = vsub.s32 %v1804_v45, %v4819_v2 }
 0x508   : > { %v1750_v55 = vsel %vm4710_vm9, %v1725_v16, %v1702_v37  ;;  %v1766_v30 = vmax.f32 %v1747_v25, %v1749_v15  ;;  %v1748_v26 = vsel %vm4706_vm8, %v1723_v19, %v1700_v22  ;;  %v1693_v22 = vsel %vm4668_vm3, %v1668_v58, %v4626_v12 }
 0x509   : > { %v3024_v46 = vpop.permute.xlu0 %3023  ;;  %v1767_v1 = vmax.f32 %v1748_v26, %v1750_v55  ;;  %v4918_v21 = vperm.slane %v1807_v36, 2  ;;  %v4922_v4 = vperm.slane %v1807_v36, 0 }
 0x50a   : > { %v3026_v28 = vunpack.i.h.bf16 %v3024_v46  ;;  %v3025_v20 = vunpack.i.l.bf16 %v3024_v46  ;;  %v4826_v6 = vsel %vm4723_vm10, %v1766_v30, %v1747_v25  ;;  %v4830_v29 = vsel %vm4739_vm12, %v1766_v30, %v1749_v15 }
 0x50b   : > { %v3029_v35 = vpop.permute.xlu1 %3028  ;;  %2023 = vmatpush.xpose.msra.mxu0 %v4826_v6  ;;  %2105 = vmatpush.xpose.msra.mxu2 %v4830_v29  ;;  %v4855_v59 = vsel %vm4727_vm11, %v1767_v1, %v1748_v26 }
 0x50c   : > { %v1644_v31 = vsel %vm1606_vm14, %v3025_v20, %v3026_v28  ;;  %v1648_v41 = vsel %vm1606_vm14, %v3021_v40, %v3025_v20  ;;  %v1656_v7 = vsel %vm1606_vm14, %v3026_v28, %v3020_v14  ;;  %v3031_v32 = vunpack.i.h.bf16 %v3029_v35  ;;  %2064 = vmatpush.xpose.msra.mxu1 %v4855_v59 }
 0x50d   : > { %v1671_v34 = vmax.f32 %v4593_v47, %v1648_v41  ;;  %v1672_v43 = vmax.f32 %v4577_v0, %v1644_v31  ;;  %v1673_v39 = vmax.f32 %v4583_v8, %v1656_v7  ;;  %v3030_v18 = vunpack.i.l.bf16 %v3029_v35 }
 0x50e   : > { %v1647_v40 = vsel %vm1606_vm14, %v3031_v32, %v3035_v48  ;;  %v4859_v14 = vsel %vm4743_vm13, %v1767_v1, %v1750_v55  ;;  %v4916_v35 = vshrl.u32 %v947_v60, 7  ;;  %v4924_v31 = vperm.slane %v1807_v36, 1 }
 0x50f   : > { %v1696_v13 = vsel %vm4664_vm2, %v1671_v34, %v4593_v47  ;;  %v1698_v48 = vsel %vm4672_vm4, %v1673_v39, %v4583_v8  ;;  %v1667_v37 = vmax.f32 %v4604_v11, %v1647_v40  ;;  %v1651_v56 = vsel %vm1606_vm14, %v3030_v18, %v3031_v32  ;;  %2146 = vmatpush.xpose.msra.mxu3 %v4859_v14 }
 0x510   : > { %v1655_v24 = vsel %vm1606_vm14, %v3036_v51, %v3030_v18  ;;  %v1666_v12 = vmax.f32 %v4610_v50, %v1651_v56  ;;  %v1697_v47 = vsel %vm4668_vm3, %v1672_v43, %v4577_v0  ;;  %v1718_v16 = vmax.f32 %v1695_v52, %v1696_v13 }
 0x511   : > { %v1692_v8 = vsel %vm4664_vm2, %v1667_v37, %v4604_v11  ;;  %v1669_v5 = vmax.f32 %v4621_v57, %v1655_v24  ;;  %v1720_v10 = vmax.f32 %v1697_v47, %v1698_v48  ;;  %v1721_v19 = vmax.f32 %v1698_v48, %v1695_v52 }
 0x512   : > { %v1743_v61 = vsel %vm4684_vm6, %v1718_v16, %v1695_v52  ;;  %v1719_v51 = vmax.f32 %v1696_v13, %v1697_v47  ;;  %v1691_v25 = vsel %vm4680_vm5, %v1666_v12, %v4610_v50  ;;  %v1715_v15 = vmax.f32 %v1692_v8, %v1693_v22 }
 0x513   : > { %v1694_v0 = vsel %vm4672_vm4, %v1669_v5, %v4621_v57  ;;  %v1745_v11 = vsel %vm4702_vm7, %v1720_v10, %v1697_v47  ;;  %v1746_v27 = vsel %vm4710_vm9, %v1721_v19, %v1698_v48  ;;  %v1714_v9 = vmax.f32 %v1691_v25, %v1692_v8 }
 0x514   : > { %v1764_v55 = vmax.f32 %v1743_v61, %v1745_v11  ;;  %v1744_v45 = vsel %vm4706_vm8, %v1719_v51, %v1696_v13  ;;  %v1716_v46 = vmax.f32 %v1693_v22, %v1694_v0  ;;  %v1717_v30 = vmax.f32 %v1694_v0, %v1691_v25 }
 0x515   : > { %v1765_v44 = vmax.f32 %v1744_v45, %v1746_v27  ;;  %v1739_v50 = vsel %vm4684_vm6, %v1714_v9, %v1691_v25  ;;  %v1740_v57 = vsel %vm4706_vm8, %v1715_v15, %v1692_v8  ;;  %v4920_v52 = vperm.slane %v1807_v36, 3 }
 0x516   : > { %v1783_v33 = vsel %vm4723_vm10, %v1764_v55, %v1743_v61  ;;  %v1785_v26 = vsel %vm4739_vm12, %v1764_v55, %v1745_v11  ;;  %v1741_v58 = vsel %vm4702_vm7, %v1716_v46, %v1693_v22  ;;  %v1742_v28 = vsel %vm4710_vm9, %v1717_v30, %v1694_v0 }
 0x517   : > { %2024 = vmatpush.xpose.msra.mxu0 %v1783_v33  ;;  %v1784_v17 = vsel %vm4727_vm11, %v1765_v44, %v1744_v45  ;;  %2106 = vmatpush.xpose.msra.mxu2 %v1785_v26  ;;  %v1786_v42 = vsel %vm4743_vm13, %v1765_v44, %v1746_v27  ;;  %v1762_v20 = vmax.f32 %v1739_v50, %v1741_v58  ;;  %v4951_v49 = vadd.s32 8, %v4916_v35 }
 0x518   : > { %2065 = vmatpush.xpose.msra.mxu1 %v1784_v17  ;;  %2147 = vmatpush.xpose.msra.mxu3 %v1786_v42  ;;  %v1763_v1 = vmax.f32 %v1740_v57, %v1742_v28  ;;  %vm1814_vm14 = vcmp.eq.s32.totalorder %v4916_v35, %v4918_v21  ;;  %vm1815_vm15 = vcmp.eq.s32.totalorder %v4916_v35, %v4920_v52  ;;  %v4970_v53 = vadd.s32 16, %v4916_v35 }
 0x519   : > { %v1779_v41 = vsel %vm4723_vm10, %v1762_v20, %v1739_v50  ;;  %v1781_v7 = vsel %vm4739_vm12, %v1762_v20, %v1741_v58  ;;  %vm1812_vm0 = vcmp.eq.s32.totalorder %v4916_v35, %v4922_v4  ;;  %vm1813_vm1 = vcmp.eq.s32.totalorder %v4916_v35, %v4924_v31 }
 0x51a   : > { %v1780_v32 = vsel %vm4727_vm11, %v1763_v1, %v1740_v57  ;;  %v1782_v60 = vsel %vm4743_vm13, %v1763_v1, %v1742_v28  ;;  %vm1818_vm2 = vcmp.eq.s32.totalorder %v4951_v49, %v4918_v21  ;;  %vm1819_vm3 = vcmp.eq.s32.totalorder %v4951_v49, %v4920_v52 }
 0x51b   : > { %2025 = vmatpush.xpose.msra.mxu0 %v1779_v41  ;;  %2107 = vmatpush.xpose.msra.mxu2 %v1781_v7  ;;  %vm1816_vm4 = vcmp.eq.s32.totalorder %v4951_v49, %v4922_v4  ;;  %vm1817_vm5 = vcmp.eq.s32.totalorder %v4951_v49, %v4924_v31  ;;  %vm1822_vm6 = vcmp.eq.s32.totalorder %v4970_v53, %v4918_v21  ;;  %v4985_v54 = vadd.s32 24, %v4916_v35 }
 0x51c   : > { %2066 = vmatpush.xpose.msra.mxu1 %v1780_v32  ;;  %2148 = vmatpush.xpose.msra.mxu3 %v1782_v60  ;;  %vm1823_vm7 = vcmp.eq.s32.totalorder %v4970_v53, %v4920_v52  ;;  %vm1820_vm8 = vcmp.eq.s32.totalorder %v4970_v53, %v4922_v4  ;;  %vm1821_vm9 = vcmp.eq.s32.totalorder %v4970_v53, %v4924_v31  ;;  %v5058_v34 = vadd.s32 48, %v4916_v35 }
 0x51d   : > { %vm1826_vm10 = vcmp.eq.s32.totalorder %v4985_v54, %v4918_v21  ;;  %vm1827_vm11 = vcmp.eq.s32.totalorder %v4985_v54, %v4920_v52  ;;  %vm1824_vm12 = vcmp.eq.s32.totalorder %v4985_v54, %v4922_v4  ;;  %vm1825_vm13 = vcmp.eq.s32.totalorder %v4985_v54, %v4924_v31 }
 0x51e   : > { %2624 = vmatmul.msk.f32.vlgmr.msra.gmra.mxu2 %vm1814_vm14, %v3158_v63  ;;  %2608 = vmatmul.msk.f32.vlgmr.msra.gmra.mxu0 %vm1812_vm0, %v3158_v63  ;;  %v1803_v43 = vadd.s32 56, %v4916_v35 }
 0x51f   : > { %2186 = vmatpush.xpose.msrb.mxu0 %v4785_v38  ;;  %2268 = vmatpush.xpose.msrb.mxu2 %v4793_v62  ;;  %v5000_v38 = vadd.s32 32, %v4916_v35 }
 0x520   : > { %2227 = vmatpush.xpose.msrb.mxu1 %v4789_v3  ;;  %2309 = vmatpush.xpose.msrb.mxu3 %v4797_v23  ;;  %v1908_v3 = vld [vmem:[%s658_s18] sm:$0xf] }
 0x521   : > { %2632 = vmatmul.msk.f32.vlgmr.msra.gmra.mxu3 %vm1815_vm15, %v3158_v63  ;;  %2616 = vmatmul.msk.f32.vlgmr.msra.gmra.mxu1 %vm1813_vm1, %v3158_v63  ;;  %v1909_v62 = vsub.s32 %v1908_v3, %v4819_v2  ;;  %vm1830_vm14 = vcmp.eq.s32.totalorder %v5000_v38, %v4918_v21  ;;  %vm1831_vm15 = vcmp.eq.s32.totalorder %v5000_v38, %v4920_v52 }
 0x522   : > { %vm1828_vm0 = vcmp.eq.s32.totalorder %v5000_v38, %v4922_v4  ;;  %vm1829_vm1 = vcmp.eq.s32.totalorder %v5000_v38, %v4924_v31 }
 0x523   : > { %2187 = vmatpush.xpose.msrb.mxu0 %v4826_v6  ;;  %2269 = vmatpush.xpose.msrb.mxu2 %v4830_v29  ;;  %v5008_v23 = vperm.slane %v1909_v62, 2  ;;  %v5022_v2 = vperm.slane %v1909_v62, 3  ;;  %v5024_v6 = vperm.slane %v1909_v62, 0  ;;  %v5029_v29 = vadd.s32 40, %v4916_v35 }
 0x524   : > { %2228 = vmatpush.xpose.msrb.mxu1 %v4855_v59  ;;  %2310 = vmatpush.xpose.msrb.mxu3 %v4859_v14  ;;  %v5031_v36 = vperm.slane %v1909_v62, 1 }
 0x526   : > { %2625 = vmatmul.msk.f32.gmra.mxu2 %vm1818_vm2, %v3158_v63  ;;  %2609 = vmatmul.msk.f32.gmra.mxu0 %vm1816_vm4, %v3158_v63  ;;  %vm1916_vm2 = vcmp.eq.s32.totalorder %v4916_v35, %v5008_v23  ;;  %vm1917_vm4 = vcmp.eq.s32.totalorder %v4916_v35, %v5022_v2 }
 0x527   : > { %2188 = vmatpush.xpose.msrb.mxu0 %v1783_v33  ;;  %2270 = vmatpush.xpose.msrb.mxu2 %v1785_v26 }
 0x528   : > { %2229 = vmatpush.xpose.msrb.mxu1 %v1784_v17  ;;  %2311 = vmatpush.xpose.msrb.mxu3 %v1786_v42 }
 0x529   : > { %2633 = vmatmul.msk.f32.gmra.mxu3 %vm1819_vm3, %v3158_v63  ;;  %2617 = vmatmul.msk.f32.gmra.mxu1 %vm1817_vm5, %v3158_v63  ;;  %vm1920_vm3 = vcmp.eq.s32.totalorder %v4951_v49, %v5008_v23  ;;  %vm1914_vm5 = vcmp.eq.s32.totalorder %v4916_v35, %v5024_v6 }
 0x52b   : > { %2189 = vmatpush.xpose.msrb.mxu0 %v1779_v41  ;;  %2271 = vmatpush.xpose.msrb.mxu2 %v1781_v7 }
 0x52c   : > { %2230 = vmatpush.xpose.msrb.mxu1 %v1780_v32  ;;  %2312 = vmatpush.xpose.msrb.mxu3 %v1782_v60 }
 0x52e   : > { %2626 = vmatmul.msk.f32.gmra.mxu2 %vm1822_vm6, %v3158_v63  ;;  %2610 = vmatmul.msk.f32.gmra.mxu0 %vm1820_vm8, %v3158_v63  ;;  %vm1915_vm6 = vcmp.eq.s32.totalorder %v4916_v35, %v5031_v36  ;;  %vm1835_vm8 = vcmp.eq.s32.totalorder %v5029_v29, %v4920_v52 }
 0x531   : > { %2634 = vmatmul.msk.f32.gmra.mxu3 %vm1823_vm7, %v3158_v63  ;;  %2618 = vmatmul.msk.f32.gmra.mxu1 %vm1821_vm9, %v3158_v63  ;;  %vm1834_vm7 = vcmp.eq.s32.totalorder %v5029_v29, %v4918_v21  ;;  %vm1832_vm9 = vcmp.eq.s32.totalorder %v5029_v29, %v4922_v4 }
 0x536   : > { %2627 = vmatmul.msk.f32.gmra.mxu2 %vm1826_vm10, %v3158_v63  ;;  %2611 = vmatmul.msk.f32.gmra.mxu0 %vm1824_vm12, %v3158_v63  ;;  %vm1833_vm10 = vcmp.eq.s32.totalorder %v5029_v29, %v4924_v31  ;;  %vm1918_vm12 = vcmp.eq.s32.totalorder %v4951_v49, %v5024_v6 }
 0x539   : > { %2635 = vmatmul.msk.f32.gmra.mxu3 %vm1827_vm11, %v3158_v63  ;;  %2619 = vmatmul.msk.f32.gmra.mxu1 %vm1825_vm13, %v3158_v63  ;;  %vm1921_vm11 = vcmp.eq.s32.totalorder %v4951_v49, %v5022_v2  ;;  %vm1919_vm13 = vcmp.eq.s32.totalorder %v4951_v49, %v5031_v36 }
 0x53e   : > { %2628 = vmatmul.msk.f32.gmra.mxu2 %vm1830_vm14, %v3158_v63  ;;  %2612 = vmatmul.msk.f32.gmra.mxu0 %vm1828_vm0, %v3158_v63  ;;  %vm1839_vm0 = vcmp.eq.s32.totalorder %v5058_v34, %v4920_v52  ;;  %vm1843_vm14 = vcmp.eq.s32.totalorder %v1803_v43, %v4920_v52 }
 0x541   : > { %2636 = vmatmul.msk.f32.gmra.mxu3 %vm1831_vm15, %v3158_v63  ;;  %2620 = vmatmul.msk.f32.gmra.mxu1 %vm1829_vm1, %v3158_v63  ;;  %vm1838_vm15 = vcmp.eq.s32.totalorder %v5058_v34, %v4918_v21  ;;  %vm1836_vm1 = vcmp.eq.s32.totalorder %v5058_v34, %v4922_v4 }
 0x546   : > { %2629 = vmatmul.msk.f32.gmra.mxu2 %vm1834_vm7, %v3158_v63  ;;  %2613 = vmatmul.msk.f32.gmra.mxu0 %vm1832_vm9, %v3158_v63  ;;  %vm1837_vm7 = vcmp.eq.s32.totalorder %v5058_v34, %v4924_v31  ;;  %vm1841_vm9 = vcmp.eq.s32.totalorder %v1803_v43, %v4924_v31 }
 0x549   : > { %2637 = vmatmul.msk.f32.gmra.mxu3 %vm1835_vm8, %v3158_v63  ;;  %2621 = vmatmul.msk.f32.gmra.mxu1 %vm1833_vm10, %v3158_v63  ;;  %vm1923_vm10 = vcmp.eq.s32.totalorder %v4970_v53, %v5031_v36  ;;  %vm1840_vm8 = vcmp.eq.s32.totalorder %v1803_v43, %v4922_v4 }
 0x54e   : > { %2630 = vmatmul.msk.f32.gmra.mxu2 %vm1838_vm15, %v3158_v63  ;;  %2614 = vmatmul.msk.f32.gmra.mxu0 %vm1836_vm1, %v3158_v63  ;;  %vm1929_vm1 = vcmp.eq.s32.totalorder %v4985_v54, %v5022_v2  ;;  %vm1927_vm15 = vcmp.eq.s32.totalorder %v4985_v54, %v5031_v36 }
 0x551   : > { %2638 = vmatmul.msk.f32.gmra.mxu3 %vm1839_vm0, %v3158_v63  ;;  %2622 = vmatmul.msk.f32.gmra.mxu1 %vm1837_vm7, %v3158_v63  ;;  %vm1842_vm0 = vcmp.eq.s32.totalorder %v1803_v43, %v4918_v21  ;;  %vm1926_vm7 = vcmp.eq.s32.totalorder %v4985_v54, %v5024_v6 }
 0x556   : > { %2631 = vmatmul.msk.f32.gmra.mxu2 %vm1842_vm0, %v3158_v63  ;;  %2615 = vmatmul.msk.f32.gmra.mxu0 %vm1840_vm8, %v3158_v63  ;;  %vm1937_vm8 = vcmp.eq.s32.totalorder %v5029_v29, %v5022_v2  ;;  %vm1941_vm0 = vcmp.eq.s32.totalorder %v5058_v34, %v5022_v2 }
 0x559   : > { %2639 = vmatmul.msk.f32.gmra.mxu3 %vm1843_vm14, %v3158_v63  ;;  %2623 = vmatmul.msk.f32.gmra.mxu1 %vm1841_vm9, %v3158_v63  ;;  %vm1936_vm14 = vcmp.eq.s32.totalorder %v5029_v29, %v5008_v23  ;;  %vm1934_vm9 = vcmp.eq.s32.totalorder %v5029_v29, %v5024_v6 }
 0x55e   : > { %2656 = vmatmul.msk.f32.vlgmr.msrb.gmra.mxu2 %vm1916_vm2, %v3158_v63  ;;  %2640 = vmatmul.msk.f32.vlgmr.msrb.gmra.mxu0 %vm1914_vm5, %v3158_v63  ;;  %vm5357_vm2 = vcmp.eq.s32.totalorder %v4970_v53, %v5008_v23  ;;  %vm5360_vm5 = vcmp.eq.s32.totalorder %v4985_v54, %v5008_v23 }
 0x561   : > { %2664 = vmatmul.msk.f32.vlgmr.msrb.gmra.mxu3 %vm1917_vm4, %v3158_v63  ;;  %2648 = vmatmul.msk.f32.vlgmr.msrb.gmra.mxu1 %vm1915_vm6, %v3158_v63  ;;  %vm5359_vm4 = vcmp.eq.s32.totalorder %v4970_v53, %v5024_v6  ;;  %vm1932_vm6 = vcmp.eq.s32.totalorder %v5000_v38, %v5008_v23 }
 0x566   : > { %2657 = vmatmul.msk.f32.gmra.mxu2 %vm1920_vm3, %v3158_v63  ;;  %2641 = vmatmul.msk.f32.gmra.mxu0 %vm1918_vm12, %v3158_v63  ;;  %vm5358_vm3 = vcmp.eq.s32.totalorder %v4970_v53, %v5022_v2  ;;  %vm1930_vm12 = vcmp.eq.s32.totalorder %v5000_v38, %v5024_v6 }
 0x569   : > { %2665 = vmatmul.msk.f32.gmra.mxu3 %vm1921_vm11, %v3158_v63  ;;  %2649 = vmatmul.msk.f32.gmra.mxu1 %vm1919_vm13, %v3158_v63  ;;  %vm1933_vm11 = vcmp.eq.s32.totalorder %v5000_v38, %v5022_v2  ;;  %vm1931_vm13 = vcmp.eq.s32.totalorder %v5000_v38, %v5031_v36 }
 0x56e   : > { %2658 = vmatmul.msk.f32.gmra.mxu2 %vm5357_vm2, %v3158_v63  ;;  %2642 = vmatmul.msk.f32.gmra.mxu0 %vm5359_vm4, %v3158_v63  ;;  %vm1944_vm2 = vcmp.eq.s32.totalorder %v1803_v43, %v5008_v23  ;;  %vm1942_vm4 = vcmp.eq.s32.totalorder %v1803_v43, %v5024_v6 }
 0x571   : > { %2666 = vmatmul.msk.f32.gmra.mxu3 %vm5358_vm3, %v3158_v63  ;;  %2650 = vmatmul.msk.f32.gmra.mxu1 %vm1923_vm10, %v3158_v63  ;;  %vm1935_vm10 = vcmp.eq.s32.totalorder %v5029_v29, %v5031_v36  ;;  %vm1945_vm3 = vcmp.eq.s32.totalorder %v1803_v43, %v5022_v2 }
 0x576   : > { %2659 = vmatmul.msk.f32.gmra.mxu2 %vm5360_vm5, %v3158_v63  ;;  %2643 = vmatmul.msk.f32.gmra.mxu0 %vm1926_vm7, %v3158_v63  ;;  %vm1939_vm7 = vcmp.eq.s32.totalorder %v5058_v34, %v5031_v36  ;;  %vm1943_vm5 = vcmp.eq.s32.totalorder %v1803_v43, %v5031_v36 }
 0x579   : > { %2667 = vmatmul.msk.f32.gmra.mxu3 %vm1929_vm1, %v3158_v63  ;;  %2651 = vmatmul.msk.f32.gmra.mxu1 %vm1927_vm15, %v3158_v63  ;;  %vm1940_vm15 = vcmp.eq.s32.totalorder %v5058_v34, %v5008_v23  ;;  %vm1938_vm1 = vcmp.eq.s32.totalorder %v5058_v34, %v5024_v6 }
 0x57e   : > { %2660 = vmatmul.msk.f32.gmra.mxu2 %vm1932_vm6, %v3158_v63  ;;  %2644 = vmatmul.msk.f32.gmra.mxu0 %vm1930_vm12, %v3158_v63  ;;  %vm2350_vm6 = vcmask 261120  }
 0x581   : > { %2668 = vmatmul.msk.f32.gmra.mxu3 %vm1933_vm11, %v3158_v63  ;;  %2652 = vmatmul.msk.f32.gmra.mxu1 %vm1931_vm13, %v3158_v63 }
 0x586   : > { %2661 = vmatmul.msk.f32.gmra.mxu2 %vm1936_vm14, %v3158_v63  ;;  %2645 = vmatmul.msk.f32.gmra.mxu0 %vm1934_vm9, %v3158_v63 }
 0x589   : > { %2669 = vmatmul.msk.f32.gmra.mxu3 %vm1937_vm8, %v3158_v63  ;;  %2653 = vmatmul.msk.f32.gmra.mxu1 %vm1935_vm10, %v3158_v63 }
 0x58e   : > { %2662 = vmatmul.msk.f32.gmra.mxu2 %vm1940_vm15, %v3158_v63  ;;  %2646 = vmatmul.msk.f32.gmra.mxu0 %vm1938_vm1, %v3158_v63 }
 0x591   : > { %2670 = vmatmul.msk.f32.gmra.mxu3 %vm1941_vm0, %v3158_v63  ;;  %2654 = vmatmul.msk.f32.gmra.mxu1 %vm1939_vm7, %v3158_v63 }
 0x596   : > { %2663 = vmatmul.msk.f32.gmra.mxu2 %vm1944_vm2, %v3158_v63  ;;  %2647 = vmatmul.msk.f32.gmra.mxu0 %vm1942_vm4, %v3158_v63 }
 0x599   : > { %2671 = vmatmul.msk.f32.gmra.mxu3 %vm1945_vm3, %v3158_v63  ;;  %2655 = vmatmul.msk.f32.gmra.mxu1 %vm1943_vm5, %v3158_v63 }
 0x59b   : > { %v2027_v39 = vpop.f32.mrf.mxu0 }
 0x59e   : > { %v2068_v18 = vpop.f32.mrf.mxu1 }
 0x59f   : > { %v2069_v40 = vadd.f32 %v2068_v18, %v2027_v39 }
 0x5a1   : > { %v2109_v59 = vpop.f32.mrf.mxu2 }
 0x5a2   : > { %v2110_v22 = vadd.f32 %v2109_v59, %v2069_v40 }
 0x5a3   : > { %v2030_v48 = vpop.f32.mrf.mxu0 }
 0x5a4   : > { %v2150_v14 = vpop.f32.mrf.mxu3 }
 0x5a5   : > { %v5207_v13 = vadd.f32 %v2150_v14, %v2110_v22 }
 0x5a6   : > { %v2071_v37 = vpop.f32.mrf.mxu1 }
 0x5a7   : > { %v2072_v56 = vadd.f32 %v2071_v37, %v2030_v48 }
 0x5a9   : > { %v2112_v24 = vpop.f32.mrf.mxu2 }
 0x5aa   : > { %v2113_v47 = vadd.f32 %v2112_v24, %v2072_v56 }
 0x5ab   : > { %v2033_v8 = vpop.f32.mrf.mxu0 }
 0x5ac   : > { %v2153_v12 = vpop.f32.mrf.mxu3 }
 0x5ad   : > { %v5209_v16 = vadd.f32 %v2153_v12, %v2113_v47 }
 0x5ae   : > { %v2074_v5 = vpop.f32.mrf.mxu1 }
 0x5af   : > { %v2075_v10 = vadd.f32 %v2074_v5, %v2033_v8 }
 0x5b1   : > { %v2115_v19 = vpop.f32.mrf.mxu2 }
 0x5b2   : > { %v2116_v51 = vadd.f32 %v2115_v19, %v2075_v10 }
 0x5b3   : > { %v2036_v15 = vpop.f32.mrf.mxu0 }
 0x5b4   : > { %v2156_v61 = vpop.f32.mrf.mxu3 }
 0x5b5   : > { %v5211_v25 = vadd.f32 %v2156_v61, %v2116_v51 }
 0x5b6   : > { %v2077_v0 = vpop.f32.mrf.mxu1 }
 0x5b7   : > { %v2078_v11 = vadd.f32 %v2077_v0, %v2036_v15 }
 0x5b9   : > { %v2118_v27 = vpop.f32.mrf.mxu2 }
 0x5ba   : > { %v2119_v55 = vadd.f32 %v2118_v27, %v2078_v11 }
 0x5bb   : > { %v2039_v46 = vpop.f32.mrf.mxu0 }
 0x5bc   : > { %v2159_v9 = vpop.f32.mrf.mxu3 }
 0x5bd   : > { %v5213_v45 = vadd.f32 %v2159_v9, %v2119_v55 }
 0x5be   : > { %v2080_v30 = vpop.f32.mrf.mxu1 }
 0x5bf   : > { %v2081_v44 = vadd.f32 %v2080_v30, %v2039_v46 }
 0x5c1   : > { %v2121_v50 = vpop.f32.mrf.mxu2 }
 0x5c2   : > { %v2122_v33 = vadd.f32 %v2121_v50, %v2081_v44 }
 0x5c3   : > { %v2042_v58 = vpop.f32.mrf.mxu0 }
 0x5c4   : > { %v2162_v57 = vpop.f32.mrf.mxu3 }
 0x5c5   : > { %v5215_v26 = vadd.f32 %v2162_v57, %v2122_v33 }
 0x5c6   : > { %v2083_v28 = vpop.f32.mrf.mxu1 }
 0x5c7   : > { %v2084_v17 = vadd.f32 %v2083_v28, %v2042_v58 }
 0x5c9   : > { %v2124_v42 = vpop.f32.mrf.mxu2 }
 0x5ca   : > { %v2125_v1 = vadd.f32 %v2124_v42, %v2084_v17 }
 0x5cb   : > { %v2045_v21 = vpop.f32.mrf.mxu0 }
 0x5cc   : > { %v2165_v20 = vpop.f32.mrf.mxu3 }
 0x5cd   : > { %v5217_v35 = vadd.f32 %v2165_v20, %v2125_v1 }
 0x5ce   : > { %v2086_v52 = vpop.f32.mrf.mxu1 }
 0x5cf   : > { %v2087_v4 = vadd.f32 %v2086_v52, %v2045_v21 }
 0x5d1   : > { %v2127_v31 = vpop.f32.mrf.mxu2 }
 0x5d2   : > { %v2128_v7 = vadd.f32 %v2127_v31, %v2087_v4 }
 0x5d3   : > { %v2048_v60 = vpop.f32.mrf.mxu0 }
 0x5d4   : > { %v2168_v41 = vpop.f32.mrf.mxu3 }
 0x5d5   : > { %v5219_v32 = vadd.f32 %v2168_v41, %v2128_v7 }
 0x5d6   : > { %v2089_v63 = vpop.f32.mrf.mxu1 }
 0x5d7   : > { %v2090_v49 = vadd.f32 %v2089_v63, %v2048_v60 }
 0x5d9   : > { %v2130_v53 = vpop.f32.mrf.mxu2 }
 0x5da   : > { %v2131_v38 = vadd.f32 %v2130_v53, %v2090_v49 }
 0x5db   : > { %v2191_v62 = vpop.f32.mrf.mxu0 }
 0x5dc   : > { %v2171_v54 = vpop.f32.mrf.mxu3 }
 0x5dd   : > { %v5221_v3 = vadd.f32 %v2171_v54, %v2131_v38 }
 0x5de   : > { %v2232_v23 = vpop.f32.mrf.mxu1 }
 0x5df   : > { %v2233_v2 = vadd.f32 %v2232_v23, %v2191_v62 }
 0x5e1   : > { %v2273_v6 = vpop.f32.mrf.mxu2 }
 0x5e2   : > { %v2274_v36 = vadd.f32 %v2273_v6, %v2233_v2 }
 0x5e3   : > { %v2194_v43 = vpop.f32.mrf.mxu0 }
 0x5e4   : > { %v2314_v29 = vpop.f32.mrf.mxu3 }
 0x5e5   : > { %v2315_v34 = vadd.f32 %v2314_v29, %v2274_v36 }
 0x5e6   : > { %v2235_v39 = vpop.f32.mrf.mxu1 }
 0x5e7   : > { %v2338_v18 = vmax.f32 %v5207_v13, %v2315_v34  ;;  %v2236_v40 = vadd.f32 %v2235_v39, %v2194_v43 }
 0x5e9   : > { %2351 = vst.msk [vmem:[%s3347_s29] sm:$0xff] %vm2350_vm6, %v2338_v18  ;;  %v2276_v59 = vpop.f32.mrf.mxu2 }
 0x5ea   : > { %v2277_v22 = vadd.f32 %v2276_v59, %v2236_v40 }
 0x5eb   : > { %v2197_v37 = vpop.f32.mrf.mxu0 }
 0x5ec   : > { %v2317_v14 = vpop.f32.mrf.mxu3 }
 0x5ed   : > { %v2318_v48 = vadd.f32 %v2317_v14, %v2277_v22 }
 0x5ee   : > { %v2238_v56 = vpop.f32.mrf.mxu1 }
 0x5ef   : > { %v2339_v24 = vmax.f32 %v5209_v16, %v2318_v48  ;;  %v2239_v12 = vadd.f32 %v2238_v56, %v2197_v37 }
 0x5f1   : > { %2352 = vst.msk [vmem:[%s3347_s29 + $0x8] sm:$0xff] %vm2350_vm6, %v2339_v24  ;;  %v2279_v47 = vpop.f32.mrf.mxu2 }
 0x5f2   : > { %v2280_v5 = vadd.f32 %v2279_v47, %v2239_v12 }
 0x5f3   : > { %v2200_v10 = vpop.f32.mrf.mxu0 }
 0x5f4   : > { %v2320_v8 = vpop.f32.mrf.mxu3 }
 0x5f5   : > { %v2321_v13 = vadd.f32 %v2320_v8, %v2280_v5 }
 0x5f6   : > { %v2241_v19 = vpop.f32.mrf.mxu1 }
 0x5f7   : > { %v2340_v61 = vmax.f32 %v5211_v25, %v2321_v13  ;;  %v2242_v51 = vadd.f32 %v2241_v19, %v2200_v10 }
 0x5f9   : > { %2353 = vst.msk [vmem:[%s3347_s29 + $0x10] sm:$0xff] %vm2350_vm6, %v2340_v61  ;;  %v2282_v15 = vpop.f32.mrf.mxu2 }
 0x5fa   : > { %v2283_v11 = vadd.f32 %v2282_v15, %v2242_v51 }
 0x5fb   : > { %v2203_v27 = vpop.f32.mrf.mxu0 }
 0x5fc   : > { %v2323_v0 = vpop.f32.mrf.mxu3 }
 0x5fd   : > { %v2324_v16 = vadd.f32 %v2323_v0, %v2283_v11 }
 0x5fe   : > { %v2244_v9 = vpop.f32.mrf.mxu1 }
 0x5ff   : > { %v2341_v55 = vmax.f32 %v5213_v45, %v2324_v16  ;;  %v2245_v46 = vadd.f32 %v2244_v9, %v2203_v27 }
 0x601   : > { %2354 = vst.msk [vmem:[%s3347_s29 + $0x18] sm:$0xff] %vm2350_vm6, %v2341_v55  ;;  %v2285_v30 = vpop.f32.mrf.mxu2 }
 0x602   : > { %v2286_v50 = vadd.f32 %v2285_v30, %v2245_v46 }
 0x603   : > { %v2206_v57 = vpop.f32.mrf.mxu0 }
 0x604   : > { %v2326_v44 = vpop.f32.mrf.mxu3 }
 0x605   : > { %v2327_v25 = vadd.f32 %v2326_v44, %v2286_v50 }
 0x606   : > { %v2247_v33 = vpop.f32.mrf.mxu1 }
 0x607   : > { %v2342_v58 = vmax.f32 %v5215_v26, %v2327_v25  ;;  %v2248_v28 = vadd.f32 %v2247_v33, %v2206_v57 }
 0x609   : > { %2355 = vst.msk [vmem:[%s3347_s29 + $0x20] sm:$0xff] %vm2350_vm6, %v2342_v58  ;;  %v2288_v17 = vpop.f32.mrf.mxu2 }
 0x60a   : > { %v2289_v20 = vadd.f32 %v2288_v17, %v2248_v28 }
 0x60b   : > { %v2209_v1 = vpop.f32.mrf.mxu0 }
 0x60c   : > { %v2329_v42 = vpop.f32.mrf.mxu3 }
 0x60d   : > { %v2330_v45 = vadd.f32 %v2329_v42, %v2289_v20 }
 0x60e   : > { %v2250_v21 = vpop.f32.mrf.mxu1 }
 0x60f   : > { %v2343_v52 = vmax.f32 %v5217_v35, %v2330_v45  ;;  %v2251_v4 = vadd.f32 %v2250_v21, %v2209_v1 }
 0x611   : > { %2356 = vst.msk [vmem:[%s3347_s29 + $0x28] sm:$0xff] %vm2350_vm6, %v2343_v52  ;;  %v2291_v31 = vpop.f32.mrf.mxu2 }
 0x612   : > { %v2292_v7 = vadd.f32 %v2291_v31, %v2251_v4 }
 0x613   : > { %v2212_v60 = vpop.f32.mrf.mxu0 }
 0x614   : > { %v2332_v41 = vpop.f32.mrf.mxu3 }
 0x615   : > { %v2333_v26 = vadd.f32 %v2332_v41, %v2292_v7 }
 0x616   : > { %v2253_v63 = vpop.f32.mrf.mxu1 }
 0x617   : > { %v2344_v49 = vmax.f32 %v5219_v32, %v2333_v26  ;;  %v2254_v53 = vadd.f32 %v2253_v63, %v2212_v60 }
 0x619   : > { %2357 = vst.msk [vmem:[%s3347_s29 + $0x30] sm:$0xff] %vm2350_vm6, %v2344_v49  ;;  %v2294_v54 = vpop.f32.mrf.mxu2 }
 0x61a   : > { %v2295_v62 = vadd.f32 %v2294_v54, %v2254_v53 }
 0x61c   : > { %v2335_v38 = vpop.f32.mrf.mxu3 }
 0x61d   : > { %v2336_v23 = vadd.f32 %v2335_v38, %v2295_v62 }
 0x61f   : > { %v2345_v35 = vmax.f32 %v5221_v3, %v2336_v23 }
 0x621   : > { %2358 = vst.msk [vmem:[%s3347_s29 + $0x38] sm:$0xff] %vm2350_vm6, %v2345_v35 }
 0x622 PF: > { %s36_s24 = sadd.s32 1, %s3144_s24   ;;  %s5361_s14 = sld [smem:[#allocation15_spill]] }
 0x623   : > { %p33_p1 = scmp.ge.s32.totalorder %s36_s24, 7   ;;  %s5362_s23 = sld [smem:[#allocation13_spill]] }
 0x624   : > { %s5363_s1 = sld [smem:[#allocation14_spill]]  ;;  %s5364_s21 = smov %s3128_s22 }
 0x625   : > { %s5365_s22 = smov %s3132_s0  ;;  %35 = sbr.rel (!%p33_p1) target bundleno = 11 (0xb), region = 113 }
 0x628   : > { %s5366_s0 = smov %s5361_s14 }
 0x62a   :  { %2410 = vsyncpa [#allocation6], 1 }
 0x62b   :  { %2412 = vsyncpa [#allocation6 + $0x1], 1 }

</bundles_post_ra>
